<compile_context>
chip_gen: v5e
topology: v5e:2x2
jax: 0.10.0
libtpu: 0.0.40
codegen_flags: <defaults>
</compile_context>

<pallas_src>
import functools

import jax
import jax.numpy as jnp
from jax import lax
from jax.experimental import pallas as pl
from jax.experimental.pallas import tpu as pltpu


def _round_up(x, m):
    return (x + m - 1) // m * m


def _gelu(x):
    # tanh-approximate GELU; used identically in kernels and reference.
    c = 0.7978845608028654  # sqrt(2/pi)
    return 0.5 * x * (1.0 + jnp.tanh(c * (x + 0.044715 * x * x * x)))


# ---------------------------------------------------------------------------
# Pallas kernels
# ---------------------------------------------------------------------------
def _dense_kernel(x_ref, w_ref, b_ref, o_ref, *, act):
    # x: (TM, K)   w: (K, Np) bf16   b: (1, Np) f32   o: (TM, Np) f32
    y = jnp.dot(x_ref[...].astype(w_ref.dtype), w_ref[...],
                preferred_element_type=jnp.float32)
    y = y + b_ref[...]
    if act == "gelu":
        y = _gelu(y)
    o_ref[...] = y.astype(o_ref.dtype)


def _dense_ln_kernel(x_ref, g_ref, bt_ref, w_ref, b_ref, o_ref, *, act, eps):
    # Fused LayerNorm (over the true, unpadded K) -> matmul -> bias -> activation.
    x = x_ref[...].astype(jnp.float32)
    mu = jnp.mean(x, axis=-1, keepdims=True)
    var = jnp.mean(jnp.square(x - mu), axis=-1, keepdims=True)
    xn = (x - mu) * lax.rsqrt(var + eps) * g_ref[...] + bt_ref[...]
    y = jnp.dot(xn.astype(w_ref.dtype), w_ref[...],
                preferred_element_type=jnp.float32)
    y = y + b_ref[...]
    if act == "gelu":
        y = _gelu(y)
    o_ref[...] = y.astype(o_ref.dtype)


def _ln_kernel(x_ref, g_ref, b_ref, o_ref, *, eps):
    x = x_ref[...].astype(jnp.float32)
    mu = jnp.mean(x, axis=-1, keepdims=True)
    var = jnp.mean(jnp.square(x - mu), axis=-1, keepdims=True)
    o_ref[...] = ((x - mu) * lax.rsqrt(var + eps) * g_ref[...]
                  + b_ref[...]).astype(o_ref.dtype)


def _attn_kernel(q_ref, kt_ref, v_ref, o_ref, *, scale):
    # One (batch*head) slice: q (1,S,hd) bf16, kt (1,hd,S) bf16, v (1,S,hd) bf16.
    q = q_ref[0]
    kt = kt_ref[0]
    v = v_ref[0]
    s = jnp.dot(q, kt, preferred_element_type=jnp.float32) * scale        # (S, S)
    m = jnp.max(s, axis=-1, keepdims=True)
    p = jnp.exp(s - m)
    p = p / jnp.sum(p, axis=-1, keepdims=True)
    o = jnp.dot(p.astype(v.dtype), v, preferred_element_type=jnp.float32)  # (S, hd)
    o_ref[0] = o.astype(o_ref.dtype)


# ---------------------------------------------------------------------------
# Pallas wrappers
# ---------------------------------------------------------------------------
def dense(x, w, b, *, ln=None, act=None, eps=1e-6, tm_max=256):
    """y = act( LayerNorm?(x) @ w + b ).  x: (M, K); w: (K, N); b: (N,)."""
    M, K = x.shape
    N = w.shape[1]
    Np = _round_up(N, 128)                 # lane-dense, unmasked output stores
    TM = min(tm_max, _round_up(M, 8))      # sublane-aligned row tile
    Mp = _round_up(M, TM)

    x_p = jnp.pad(x, ((0, Mp - M), (0, 0)))
    w_p = jnp.pad(w.astype(jnp.bfloat16), ((0, 0), (0, Np - N)))
    b_p = jnp.pad(b.astype(jnp.float32), (0, Np - N)).reshape(1, Np)

    grid = (Mp // TM,)
    cost = pl.CostEstimate(
        flops=2 * Mp * K * Np,
        transcendentals=Mp * Np if act == "gelu" else 0,
        bytes_accessed=int(x_p.size) * x_p.dtype.itemsize
        + int(w_p.size) * 2 + Mp * Np * 4)

    if ln is None:
        kernel = functools.partial(_dense_kernel, act=act)
        in_specs = [
            pl.BlockSpec((TM, K), lambda i: (i, 0)),    # row tile of activations
            pl.BlockSpec((K, Np), lambda i: (0, 0)),    # resident weight
            pl.BlockSpec((1, Np), lambda i: (0, 0)),    # resident bias
        ]
        args = (x_p, w_p, b_p)
    else:
        gamma, beta = ln
        g = gamma.astype(jnp.float32).reshape(1, K)
        bt = beta.astype(jnp.float32).reshape(1, K)
        kernel = functools.partial(_dense_ln_kernel, act=act, eps=eps)
        in_specs = [
            pl.BlockSpec((TM, K), lambda i: (i, 0)),
            pl.BlockSpec((1, K), lambda i: (0, 0)),
            pl.BlockSpec((1, K), lambda i: (0, 0)),
            pl.BlockSpec((K, Np), lambda i: (0, 0)),
            pl.BlockSpec((1, Np), lambda i: (0, 0)),
        ]
        args = (x_p, g, bt, w_p, b_p)

    out = pl.pallas_call(
        kernel,
        out_shape=jax.ShapeDtypeStruct((Mp, Np), jnp.float32),
        grid_spec=pltpu.PrefetchScalarGridSpec(
            num_scalar_prefetch=0,
            grid=grid,
            in_specs=in_specs,
            out_specs=pl.BlockSpec((TM, Np), lambda i: (i, 0)),
        ),
        compiler_params=pltpu.CompilerParams(dimension_semantics=("parallel",)),
        cost_estimate=cost,
    )(*args)
    return out[:M, :N]


def layernorm(x, gamma, beta, *, eps=1e-6, tm_max=256):
    """Row-wise LayerNorm over the last dim.  x: (M, K)."""
    M, K = x.shape
    TM = min(tm_max, _round_up(M, 8))
    Mp = _round_up(M, TM)
    x_p = jnp.pad(x, ((0, Mp - M), (0, 0)))
    g = gamma.astype(jnp.float32).reshape(1, K)
    b = beta.astype(jnp.float32).reshape(1, K)
    out = pl.pallas_call(
        functools.partial(_ln_kernel, eps=eps),
        out_shape=jax.ShapeDtypeStruct((Mp, K), jnp.float32),
        grid_spec=pltpu.PrefetchScalarGridSpec(
            num_scalar_prefetch=0,
            grid=(Mp // TM,),
            in_specs=[pl.BlockSpec((TM, K), lambda i: (i, 0)),
                      pl.BlockSpec((1, K), lambda i: (0, 0)),
                      pl.BlockSpec((1, K), lambda i: (0, 0))],
            out_specs=pl.BlockSpec((TM, K), lambda i: (i, 0)),
        ),
        compiler_params=pltpu.CompilerParams(dimension_semantics=("parallel",)),
    )(x_p, g, b)
    return out[:M]


def mhsa(q, k, v, *, scale):
    """Full attention per (batch*head).  q/k/v: (BH, S, hd) bf16 -> (BH, S, hd) f32."""
    BH, S, hd = q.shape
    kt = jnp.transpose(k, (0, 2, 1))                    # host glue: (BH, hd, S)
    out = pl.pallas_call(
        functools.partial(_attn_kernel, scale=scale),
        out_shape=jax.ShapeDtypeStruct((BH, S, hd), jnp.float32),
        grid_spec=pltpu.PrefetchScalarGridSpec(
            num_scalar_prefetch=0,
            grid=(BH,),
            in_specs=[pl.BlockSpec((1, S, hd), lambda i: (i, 0, 0)),
                      pl.BlockSpec((1, hd, S), lambda i: (i, 0, 0)),
                      pl.BlockSpec((1, S, hd), lambda i: (i, 0, 0))],
            out_specs=pl.BlockSpec((1, S, hd), lambda i: (i, 0, 0)),
        ),
        compiler_params=pltpu.CompilerParams(dimension_semantics=("parallel",)),
    )(q, kt, v)
    return out


# ---------------------------------------------------------------------------
# Host glue (pure data movement — kept in XLA)
# ---------------------------------------------------------------------------
def extract_patches(x, kernel, stride):
    """(B, C, H, W) -> (B*nh*nw, C*kh*kw), feature order (C, kh, kw) = Conv2d flatten."""
    B, C, H, W = x.shape
    kh, kw = kernel
    sh, sw = stride
    nh = (H - kh) // sh + 1
    nw = (W - kw) // sw + 1
    hi = (jnp.arange(nh) * sh)[:, None] + jnp.arange(kh)[None, :]        # (nh, kh)
    wi = (jnp.arange(nw) * sw)[:, None] + jnp.arange(kw)[None, :]        # (nw, kw)
    p = x[:, :, hi[:, :, None, None], wi[None, None, :, :]]              # (B,C,nh,kh,nw,kw)
    p = p.transpose(0, 2, 4, 1, 3, 5).reshape(B * nh * nw, C * kh * kw)
    return p, nh, nw


def _split_heads(qkv, B, S, H, hd):
    qkv = qkv.reshape(B, S, 3, H, hd).transpose(2, 0, 3, 1, 4)           # (3,B,H,S,hd)
    q, k, v = qkv[0], qkv[1], qkv[2]
    return (q.reshape(B * H, S, hd), k.reshape(B * H, S, hd),
            v.reshape(B * H, S, hd))


def _merge_heads(x, B, S, H, hd):
    return x.reshape(B, H, S, hd).transpose(0, 2, 1, 3).reshape(B * S, H * hd)


# ---------------------------------------------------------------------------
# Pure-JAX reference ops (matching numerics: bf16 matmul inputs, f32 accumulate)
# ---------------------------------------------------------------------------
def _ref_dense(x, w, b, *, ln=None, act=None, eps=1e-6):
    x = x.astype(jnp.float32)
    if ln is not None:
        g, bt = ln
        mu = jnp.mean(x, axis=-1, keepdims=True)
        var = jnp.mean(jnp.square(x - mu), axis=-1, keepdims=True)
        x = ((x - mu) * lax.rsqrt(var + eps) * g.astype(jnp.float32)
             + bt.astype(jnp.float32))
    xb = x.astype(jnp.bfloat16).astype(jnp.float32)
    wb = w.astype(jnp.bfloat16).astype(jnp.float32)
    y = xb @ wb + b.astype(jnp.float32)
    if act == "gelu":
        y = _gelu(y)
    return y


def _ref_layernorm(x, gamma, beta, *, eps=1e-6):
    x = x.astype(jnp.float32)
    mu = jnp.mean(x, axis=-1, keepdims=True)
    var = jnp.mean(jnp.square(x - mu), axis=-1, keepdims=True)
    return (x - mu) * lax.rsqrt(var + eps) * gamma + beta


def _ref_attn(q, k, v, *, scale):
    qf, kf, vf = (t.astype(jnp.float32) for t in (q, k, v))
    s = jnp.einsum("bsd,btd->bst", qf, kf) * scale
    m = jnp.max(s, axis=-1, keepdims=True)
    p = jnp.exp(s - m)
    p = p / jnp.sum(p, axis=-1, keepdims=True)
    p = p.astype(jnp.bfloat16).astype(jnp.float32)
    return jnp.einsum("bst,btd->bsd", p, vf)


PALLAS_OPS = dict(dense=dense, ln=layernorm, attn=mhsa)
REF_OPS = dict(dense=_ref_dense, ln=_ref_layernorm, attn=_ref_attn)


# ---------------------------------------------------------------------------
# Model forward (shared between the Pallas and reference op sets)
# ---------------------------------------------------------------------------
def forward_once(x, p, cfg, ops):
    """AST forward_once: (B, tdim, fdim) spectrogram -> (B, E) embedding."""
    dense_fn, ln_fn, attn_fn = ops["dense"], ops["ln"], ops["attn"]
    B = x.shape[0]
    E = cfg["embed_dim"]
    H = cfg["num_heads"]
    hd = E // H
    scale = float(hd) ** -0.5

    # x.unsqueeze(1).transpose(2, 3)  ->  (B, 1, F, T)
    x4 = jnp.transpose(x[:, None, :, :], (0, 1, 3, 2))
    patches, nh, nw = extract_patches(x4, cfg["kernel"], cfg["stride"])
    patches = patches.astype(jnp.bfloat16)                 # halve matmul-input HBM
    w_mat = p["proj_w"].reshape(E, -1).T                    # (C*kh*kw, E)
    tok = dense_fn(patches, w_mat, p["proj_b"])             # (B*N, E)
    N = nh * nw
    tok = tok.reshape(B, N, E)

    cls = jnp.broadcast_to(p["cls_token"], (B, 1, E))
    dist = jnp.broadcast_to(p["dist_token"], (B, 1, E))
    xs = jnp.concatenate([cls, dist, tok], axis=1) + p["pos_embed"]    # (B, S, E)
    S = N + 2

    for blk in p["blocks"]:
        x2d = xs.reshape(B * S, E)
        qkv = dense_fn(x2d, blk["qkv_w"], blk["qkv_b"],
                       ln=(blk["ln1_g"], blk["ln1_b"]), eps=1e-6)      # (B*S, 3E)
        q, k, v = _split_heads(qkv, B, S, H, hd)
        q, k, v = (t.astype(jnp.bfloat16) for t in (q, k, v))
        ao = attn_fn(q, k, v, scale=scale)                             # (B*H, S, hd)
        ao = _merge_heads(ao, B, S, H, hd)                             # (B*S, E)
        xs = xs + dense_fn(ao, blk["proj_w"], blk["proj_b"]).reshape(B, S, E)

        x2d = xs.reshape(B * S, E)
        h = dense_fn(x2d, blk["fc1_w"], blk["fc1_b"],
                     ln=(blk["ln2_g"], blk["ln2_b"]), act="gelu", eps=1e-6)
        xs = xs + dense_fn(h, blk["fc2_w"], blk["fc2_b"]).reshape(B, S, E)

    # self.v.norm(x); (x[:,0] + x[:,1]) / 2  — only cls/dist rows are consumed.
    tok01 = xs[:, :2, :].reshape(B * 2, E)
    tok01 = ln_fn(tok01, p["norm_g"], p["norm_b"], eps=1e-6).reshape(B, 2, E)
    return (tok01[:, 0] + tok01[:, 1]) * 0.5


def siamese_forward(x1, x2, p, cfg, ops):
    """Siamese_ASTModel.forward with fc == 'm': returns a (B, 1) logit."""
    e1 = forward_once(x1, p, cfg, ops)
    e2 = forward_once(x2, p, cfg, ops)
    combined = e1 * e2
    out = ops["dense"](combined, p["fcm_w"], p["fcm_b"],
                       ln=(p["fcm_ln_g"], p["fcm_ln_b"]), eps=1e-5)
    return out


# ---------------------------------------------------------------------------
# Parameter init
# ---------------------------------------------------------------------------
def init_params(key, cfg):
    E = cfg["embed_dim"]
    depth = cfg["depth"]
    kh, kw = cfg["kernel"]
    mlp = cfg["mlp_ratio"] * E
    f_dim = (cfg["fdim"] - kh) // cfg["stride"][0] + 1
    t_dim = (cfg["tdim"] - kw) // cfg["stride"][1] + 1
    S = f_dim * t_dim + 2

    keys = iter(jax.random.split(key, 16 + 12 * depth))

    def nrm(shape, s=0.02):
        return s * jax.random.normal(next(keys), shape, jnp.float32)

    blocks = []
    for _ in range(depth):
        blocks.append(dict(
            ln1_g=1.0 + nrm((E,), 0.05), ln1_b=nrm((E,)),
            qkv_w=nrm((E, 3 * E)), qkv_b=nrm((3 * E,)),
            proj_w=nrm((E, E)), proj_b=nrm((E,)),
            ln2_g=1.0 + nrm((E,), 0.05), ln2_b=nrm((E,)),
            fc1_w=nrm((E, mlp)), fc1_b=nrm((mlp,)),
            fc2_w=nrm((mlp, E)), fc2_b=nrm((E,)),
        ))
    p = dict(
        proj_w=nrm((E, 1, kh, kw), 0.05), proj_b=nrm((E,)),
        cls_token=nrm((1, 1, E), 0.5), dist_token=nrm((1, 1, E), 0.5),
        pos_embed=nrm((1, S, E), 0.5),
        blocks=blocks,
        norm_g=1.0 + nrm((E,), 0.05), norm_b=nrm((E,)),
        fcm_ln_g=1.0 + nrm((E,), 0.05), fcm_ln_b=nrm((E,)),
        fcm_w=nrm((E, 1)), fcm_b=nrm((1,)),
    )
    return p, S


if __name__ == "__main__":
    # Small config consistent with the module: 1-channel spectrogram, overlapping
    # patch conv (kernel 8, stride 4 — analogue of kernel 16 / stride 10 in AST),
    # embed=32, 2 heads, 2 blocks, mlp_ratio=4, Siamese fc == 'm'.
    cfg = dict(embed_dim=32, num_heads=2, depth=2, mlp_ratio=4,
               kernel=(8, 8), stride=(4, 4), fdim=16, tdim=32)

    key = jax.random.PRNGKey(0)
    kp, k1, k2 = jax.random.split(key, 3)
    params, S = init_params(kp, cfg)

    B = 2
    x1 = jax.random.normal(k1, (B, cfg["tdim"], cfg["fdim"]), jnp.float32)
    x2 = jax.random.normal(k2, (B, cfg["tdim"], cfg["fdim"]), jnp.float32)

    siamese_pallas = jax.jit(
        lambda a, b: siamese_forward(a, b, params, cfg, PALLAS_OPS))
    out = jax.block_until_ready(siamese_pallas(x1, x2))

    # Pure-JAX reference with matching numerics (bf16 matmul inputs, f32 accumulate,
    # f32 LayerNorm/softmax) — mirrors the torch autocast forward.
    ref = siamese_forward(x1, x2, params, cfg, REF_OPS)
    e1 = forward_once(x1, params, cfg, PALLAS_OPS)
    e1_ref = forward_once(x1, params, cfg, REF_OPS)

    assert out.shape == (B, 1)
    assert bool(jnp.all(jnp.isfinite(out)))
    assert jnp.allclose(e1, e1_ref, atol=1e-2, rtol=1e-2)
    assert jnp.allclose(out, ref, atol=1e-2, rtol=1e-2)

    print("KERNEL_OK")
</pallas_src>

<mosaic_0001>
module attributes {stable_mosaic.version = 11 : i64} {
  func.func @_dense_kernel(%arg0: i32, %arg1: memref<48x64xbf16, #tpu.memory_space<vmem>>, %arg2: memref<64x128xbf16, #tpu.memory_space<vmem>>, %arg3: memref<1x128xf32, #tpu.memory_space<vmem>>, %arg4: memref<48x128xf32, #tpu.memory_space<vmem>>) attributes {dimension_semantics = [#tpu.dimension_semantics<parallel>], iteration_bounds = array<i64: 1>, scalar_prefetch = 0 : i64, scratch_operands = 0 : i64, tpu.core_type = #tpu.core_type<tc>, window_params = [{transform_indices = @transform_0, window_bounds = array<i64: 48, 64>}, {pipeline_mode = #tpu.pipeline_mode<synchronous>, transform_indices = @transform_1, window_bounds = array<i64: 64, 128>}, {pipeline_mode = #tpu.pipeline_mode<synchronous>, transform_indices = @transform_2, window_bounds = array<i64: 1, 128>}, {transform_indices = @transform_3, window_bounds = array<i64: 48, 128>}]} {
    %c0 = arith.constant 0 : index
    %c0_0 = arith.constant 0 : index
    %0 = vector.load %arg1[%c0, %c0_0] : memref<48x64xbf16, #tpu.memory_space<vmem>>, vector<48x64xbf16>
    %c0_1 = arith.constant 0 : index
    %c0_2 = arith.constant 0 : index
    %1 = vector.load %arg2[%c0_1, %c0_2] : memref<64x128xbf16, #tpu.memory_space<vmem>>, vector<64x128xbf16>
    %cst = arith.constant dense<0.000000e+00> : vector<48x128xf32>
    %2 = tpu.matmul %0, %1, %cst {dimension_numbers = #tpu.dot_dimension_numbers<[1], [0], [0], [1], [0, 0, 1, 1], [], []>} : vector<48x64xbf16>, vector<64x128xbf16>, vector<48x128xf32> -> vector<48x128xf32>
    %c0_3 = arith.constant 0 : index
    %c0_4 = arith.constant 0 : index
    %3 = vector.load %arg3[%c0_3, %c0_4] : memref<1x128xf32, #tpu.memory_space<vmem>>, vector<1x128xf32>
    %4 = vector.broadcast %3 : vector<1x128xf32> to vector<48x128xf32>
    %5 = arith.addf %2, %4 : vector<48x128xf32>
    %c0_5 = arith.constant 0 : index
    %c0_6 = arith.constant 0 : index
    %6 = vector.load %arg4[%c0_5, %c0_6] : memref<48x128xf32, #tpu.memory_space<vmem>>, vector<48x128xf32>
    tpu.vector_store %arg4[%c0_5, %c0_6], %5 {strides = array<i32>} : memref<48x128xf32, #tpu.memory_space<vmem>>, vector<48x128xf32>,
    return
  }
  func.func @transform_0(%arg0: i32) -> (i32, i32) {
    %c0_i32 = arith.constant 0 : i32
    %c0_i32_0 = arith.constant 0 : i32
    return %arg0, %c0_i32 : i32, i32
  }
  func.func @transform_1(%arg0: i32) -> (i32, i32) {
    %c0_i32 = arith.constant 0 : i32
    %c0_i32_0 = arith.constant 0 : i32
    %c0_i32_1 = arith.constant 0 : i32
    return %c0_i32, %c0_i32_0 : i32, i32
  }
  func.func @transform_2(%arg0: i32) -> (i32, i32) {
    %c0_i32 = arith.constant 0 : i32
    %c0_i32_0 = arith.constant 0 : i32
    %c0_i32_1 = arith.constant 0 : i32
    return %c0_i32, %c0_i32_0 : i32, i32
  }
  func.func @transform_3(%arg0: i32) -> (i32, i32) {
    %c0_i32 = arith.constant 0 : i32
    %c0_i32_0 = arith.constant 0 : i32
    return %arg0, %c0_i32 : i32, i32
  }
}

module attributes {stable_mosaic.version = 11 : i64} {
  func.func @_dense_ln_kernel(%arg0: i32, %arg1: memref<48x32xf32, #tpu.memory_space<vmem>>, %arg2: memref<1x32xf32, #tpu.memory_space<vmem>>, %arg3: memref<1x32xf32, #tpu.memory_space<vmem>>, %arg4: memref<32x128xbf16, #tpu.memory_space<vmem>>, %arg5: memref<1x128xf32, #tpu.memory_space<vmem>>, %arg6: memref<48x128xf32, #tpu.memory_space<vmem>>) attributes {dimension_semantics = [#tpu.dimension_semantics<parallel>], iteration_bounds = array<i64: 1>, scalar_prefetch = 0 : i64, scratch_operands = 0 : i64, tpu.core_type = #tpu.core_type<tc>, window_params = [{transform_indices = @transform_0, window_bounds = array<i64: 48, 32>}, {pipeline_mode = #tpu.pipeline_mode<synchronous>, transform_indices = @transform_1, window_bounds = array<i64: 1, 32>}, {pipeline_mode = #tpu.pipeline_mode<synchronous>, transform_indices = @transform_2, window_bounds = array<i64: 1, 32>}, {pipeline_mode = #tpu.pipeline_mode<synchronous>, transform_indices = @transform_3, window_bounds = array<i64: 32, 128>}, {pipeline_mode = #tpu.pipeline_mode<synchronous>, transform_indices = @transform_4, window_bounds = array<i64: 1, 128>}, {transform_indices = @transform_5, window_bounds = array<i64: 48, 128>}]} {
    %c0 = arith.constant 0 : index
    %c0_0 = arith.constant 0 : index
    %0 = vector.load %arg1[%c0, %c0_0] : memref<48x32xf32, #tpu.memory_space<vmem>>, vector<48x32xf32>
    %cst = arith.constant dense<0.000000e+00> : vector<48xf32>
    %1 = vector.multi_reduction <add>, %0, %cst [1] : vector<48x32xf32> to vector<48xf32>
    %2 = vector.shape_cast %1 : vector<48xf32> to vector<48x1xf32>
    %cst_1 = arith.constant 3.200000e+01 : f32
    %3 = vector.broadcast %cst_1 : f32 to vector<48x1xf32>
    %4 = arith.divf %2, %3 : vector<48x1xf32>
    %5 = vector.broadcast %4 : vector<48x1xf32> to vector<48x32xf32>
    %6 = arith.subf %0, %5 : vector<48x32xf32>
    %7 = arith.mulf %6, %6 : vector<48x32xf32>
    %cst_2 = arith.constant dense<0.000000e+00> : vector<48xf32>
    %8 = vector.multi_reduction <add>, %7, %cst_2 [1] : vector<48x32xf32> to vector<48xf32>
    %9 = vector.shape_cast %8 : vector<48xf32> to vector<48x1xf32>
    %cst_3 = arith.constant 3.200000e+01 : f32
    %10 = vector.broadcast %cst_3 : f32 to vector<48x1xf32>
    %11 = arith.divf %9, %10 : vector<48x1xf32>
    %12 = vector.broadcast %4 : vector<48x1xf32> to vector<48x32xf32>
    %13 = arith.subf %0, %12 : vector<48x32xf32>
    %cst_4 = arith.constant 9.99999997E-7 : f32
    %14 = vector.broadcast %cst_4 : f32 to vector<48x1xf32>
    %15 = arith.addf %11, %14 : vector<48x1xf32>
    %16 = math.rsqrt %15 : vector<48x1xf32>
    %17 = vector.broadcast %16 : vector<48x1xf32> to vector<48x32xf32>
    %18 = arith.mulf %13, %17 : vector<48x32xf32>
    %c0_5 = arith.constant 0 : index
    %c0_6 = arith.constant 0 : index
    %19 = vector.load %arg2[%c0_5, %c0_6] : memref<1x32xf32, #tpu.memory_space<vmem>>, vector<1x32xf32>
    %20 = vector.broadcast %19 : vector<1x32xf32> to vector<48x32xf32>
    %21 = arith.mulf %18, %20 : vector<48x32xf32>
    %c0_7 = arith.constant 0 : index
    %c0_8 = arith.constant 0 : index
    %22 = vector.load %arg3[%c0_7, %c0_8] : memref<1x32xf32, #tpu.memory_space<vmem>>, vector<1x32xf32>
    %23 = vector.broadcast %22 : vector<1x32xf32> to vector<48x32xf32>
    %24 = arith.addf %21, %23 : vector<48x32xf32>
    %25 = arith.truncf %24 : vector<48x32xf32> to vector<48x32xbf16>
    %c0_9 = arith.constant 0 : index
    %c0_10 = arith.constant 0 : index
    %26 = vector.load %arg4[%c0_9, %c0_10] : memref<32x128xbf16, #tpu.memory_space<vmem>>, vector<32x128xbf16>
    %cst_11 = arith.constant dense<0.000000e+00> : vector<48x128xf32>
    %27 = tpu.matmul %25, %26, %cst_11 {dimension_numbers = #tpu.dot_dimension_numbers<[1], [0], [0], [1], [0, 0, 1, 1], [], []>} : vector<48x32xbf16>, vector<32x128xbf16>, vector<48x128xf32> -> vector<48x128xf32>
    %c0_12 = arith.constant 0 : index
    %c0_13 = arith.constant 0 : index
    %28 = vector.load %arg5[%c0_12, %c0_13] : memref<1x128xf32, #tpu.memory_space<vmem>>, vector<1x128xf32>
    %29 = vector.broadcast %28 : vector<1x128xf32> to vector<48x128xf32>
    %30 = arith.addf %27, %29 : vector<48x128xf32>
    %c0_14 = arith.constant 0 : index
    %c0_15 = arith.constant 0 : index
    %31 = vector.load %arg6[%c0_14, %c0_15] : memref<48x128xf32, #tpu.memory_space<vmem>>, vector<48x128xf32>
    tpu.vector_store %arg6[%c0_14, %c0_15], %30 {strides = array<i32>} : memref<48x128xf32, #tpu.memory_space<vmem>>, vector<48x128xf32>,
    return
  }
  func.func @transform_0(%arg0: i32) -> (i32, i32) {
    %c0_i32 = arith.constant 0 : i32
    %c0_i32_0 = arith.constant 0 : i32
    return %arg0, %c0_i32 : i32, i32
  }
  func.func @transform_1(%arg0: i32) -> (i32, i32) {
    %c0_i32 = arith.constant 0 : i32
    %c0_i32_0 = arith.constant 0 : i32
    %c0_i32_1 = arith.constant 0 : i32
    return %c0_i32, %c0_i32_0 : i32, i32
  }
  func.func @transform_2(%arg0: i32) -> (i32, i32) {
    %c0_i32 = arith.constant 0 : i32
    %c0_i32_0 = arith.constant 0 : i32
    %c0_i32_1 = arith.constant 0 : i32
    return %c0_i32, %c0_i32_0 : i32, i32
  }
  func.func @transform_3(%arg0: i32) -> (i32, i32) {
    %c0_i32 = arith.constant 0 : i32
    %c0_i32_0 = arith.constant 0 : i32
    %c0_i32_1 = arith.constant 0 : i32
    return %c0_i32, %c0_i32_0 : i32, i32
  }
  func.func @transform_4(%arg0: i32) -> (i32, i32) {
    %c0_i32 = arith.constant 0 : i32
    %c0_i32_0 = arith.constant 0 : i32
    %c0_i32_1 = arith.constant 0 : i32
    return %c0_i32, %c0_i32_0 : i32, i32
  }
  func.func @transform_5(%arg0: i32) -> (i32, i32) {
    %c0_i32 = arith.constant 0 : i32
    %c0_i32_0 = arith.constant 0 : i32
    return %arg0, %c0_i32 : i32, i32
  }
}

module attributes {stable_mosaic.version = 11 : i64} {
  func.func @_attn_kernel(%arg0: i32, %arg1: memref<1x23x16xbf16, #tpu.memory_space<vmem>>, %arg2: memref<1x16x23xbf16, #tpu.memory_space<vmem>>, %arg3: memref<1x23x16xbf16, #tpu.memory_space<vmem>>, %arg4: memref<1x23x16xf32, #tpu.memory_space<vmem>>) attributes {dimension_semantics = [#tpu.dimension_semantics<parallel>], iteration_bounds = array<i64: 4>, scalar_prefetch = 0 : i64, scratch_operands = 0 : i64, tpu.core_type = #tpu.core_type<tc>, window_params = [{transform_indices = @transform_0, window_bounds = array<i64: 1, 23, 16>}, {transform_indices = @transform_1, window_bounds = array<i64: 1, 16, 23>}, {transform_indices = @transform_2, window_bounds = array<i64: 1, 23, 16>}, {transform_indices = @transform_3, window_bounds = array<i64: 1, 23, 16>}]} {
    %c0 = arith.constant 0 : index
    %c0_0 = arith.constant 0 : index
    %c0_1 = arith.constant 0 : index
    %0 = vector.load %arg1[%c0, %c0_0, %c0_1] : memref<1x23x16xbf16, #tpu.memory_space<vmem>>, vector<1x23x16xbf16>
    %1 = vector.shape_cast %0 : vector<1x23x16xbf16> to vector<23x16xbf16>
    %c0_2 = arith.constant 0 : index
    %c0_3 = arith.constant 0 : index
    %c0_4 = arith.constant 0 : index
    %2 = vector.load %arg2[%c0_2, %c0_3, %c0_4] : memref<1x16x23xbf16, #tpu.memory_space<vmem>>, vector<1x16x23xbf16>
    %3 = vector.shape_cast %2 : vector<1x16x23xbf16> to vector<16x23xbf16>
    %c0_5 = arith.constant 0 : index
    %c0_6 = arith.constant 0 : index
    %c0_7 = arith.constant 0 : index
    %4 = vector.load %arg3[%c0_5, %c0_6, %c0_7] : memref<1x23x16xbf16, #tpu.memory_space<vmem>>, vector<1x23x16xbf16>
    %5 = vector.shape_cast %4 : vector<1x23x16xbf16> to vector<23x16xbf16>
    %cst = arith.constant dense<0.000000e+00> : vector<23x23xf32>
    %6 = tpu.matmul %1, %3, %cst {dimension_numbers = #tpu.dot_dimension_numbers<[1], [0], [0], [1], [0, 0, 1, 1], [], []>} : vector<23x16xbf16>, vector<16x23xbf16>, vector<23x23xf32> -> vector<23x23xf32>
    %cst_8 = arith.constant 2.500000e-01 : f32
    %7 = vector.broadcast %cst_8 : f32 to vector<23x23xf32>
    %8 = arith.mulf %6, %7 : vector<23x23xf32>
    %cst_9 = arith.constant dense<0xFF800000> : vector<23xf32>
    %9 = vector.multi_reduction <maximumf>, %8, %cst_9 [1] : vector<23x23xf32> to vector<23xf32>
    %10 = vector.shape_cast %9 : vector<23xf32> to vector<23x1xf32>
    %11 = vector.broadcast %10 : vector<23x1xf32> to vector<23x23xf32>
    %12 = arith.subf %8, %11 : vector<23x23xf32>
    %13 = math.exp %12 : vector<23x23xf32>
    %cst_10 = arith.constant dense<0.000000e+00> : vector<23xf32>
    %14 = vector.multi_reduction <add>, %13, %cst_10 [1] : vector<23x23xf32> to vector<23xf32>
    %15 = vector.shape_cast %14 : vector<23xf32> to vector<23x1xf32>
    %16 = vector.broadcast %15 : vector<23x1xf32> to vector<23x23xf32>
    %17 = arith.divf %13, %16 : vector<23x23xf32>
    %18 = arith.truncf %17 : vector<23x23xf32> to vector<23x23xbf16>
    %cst_11 = arith.constant dense<0.000000e+00> : vector<23x16xf32>
    %19 = tpu.matmul %18, %5, %cst_11 {dimension_numbers = #tpu.dot_dimension_numbers<[1], [0], [0], [1], [0, 0, 1, 1], [], []>} : vector<23x23xbf16>, vector<23x16xbf16>, vector<23x16xf32> -> vector<23x16xf32>
    %c0_12 = arith.constant 0 : index
    %c0_13 = arith.constant 0 : index
    %c0_14 = arith.constant 0 : index
    %20 = vector.load %arg4[%c0_12, %c0_13, %c0_14] : memref<1x23x16xf32, #tpu.memory_space<vmem>>, vector<1x23x16xf32>
    %21 = vector.shape_cast %20 : vector<1x23x16xf32> to vector<23x16xf32>
    %22 = vector.shape_cast %19 : vector<23x16xf32> to vector<1x23x16xf32>
    tpu.vector_store %arg4[%c0_12, %c0_13, %c0_14], %22 {strides = array<i32>} : memref<1x23x16xf32, #tpu.memory_space<vmem>>, vector<1x23x16xf32>,
    return
  }
  func.func @transform_0(%arg0: i32) -> (i32, i32, i32) {
    %c0_i32 = arith.constant 0 : i32
    %c0_i32_0 = arith.constant 0 : i32
    %c0_i32_1 = arith.constant 0 : i32
    return %arg0, %c0_i32, %c0_i32_0 : i32, i32, i32
  }
  func.func @transform_1(%arg0: i32) -> (i32, i32, i32) {
    %c0_i32 = arith.constant 0 : i32
    %c0_i32_0 = arith.constant 0 : i32
    %c0_i32_1 = arith.constant 0 : i32
    return %arg0, %c0_i32, %c0_i32_0 : i32, i32, i32
  }
  func.func @transform_2(%arg0: i32) -> (i32, i32, i32) {
    %c0_i32 = arith.constant 0 : i32
    %c0_i32_0 = arith.constant 0 : i32
    %c0_i32_1 = arith.constant 0 : i32
    return %arg0, %c0_i32, %c0_i32_0 : i32, i32, i32
  }
  func.func @transform_3(%arg0: i32) -> (i32, i32, i32) {
    %c0_i32 = arith.constant 0 : i32
    %c0_i32_0 = arith.constant 0 : i32
    %c0_i32_1 = arith.constant 0 : i32
    return %arg0, %c0_i32, %c0_i32_0 : i32, i32, i32
  }
}

module attributes {stable_mosaic.version = 11 : i64} {
  func.func @_dense_kernel(%arg0: i32, %arg1: memref<48x32xf32, #tpu.memory_space<vmem>>, %arg2: memref<32x128xbf16, #tpu.memory_space<vmem>>, %arg3: memref<1x128xf32, #tpu.memory_space<vmem>>, %arg4: memref<48x128xf32, #tpu.memory_space<vmem>>) attributes {dimension_semantics = [#tpu.dimension_semantics<parallel>], iteration_bounds = array<i64: 1>, scalar_prefetch = 0 : i64, scratch_operands = 0 : i64, tpu.core_type = #tpu.core_type<tc>, window_params = [{transform_indices = @transform_0, window_bounds = array<i64: 48, 32>}, {pipeline_mode = #tpu.pipeline_mode<synchronous>, transform_indices = @transform_1, window_bounds = array<i64: 32, 128>}, {pipeline_mode = #tpu.pipeline_mode<synchronous>, transform_indices = @transform_2, window_bounds = array<i64: 1, 128>}, {transform_indices = @transform_3, window_bounds = array<i64: 48, 128>}]} {
    %c0 = arith.constant 0 : index
    %c0_0 = arith.constant 0 : index
    %0 = vector.load %arg1[%c0, %c0_0] : memref<48x32xf32, #tpu.memory_space<vmem>>, vector<48x32xf32>
    %1 = arith.truncf %0 : vector<48x32xf32> to vector<48x32xbf16>
    %c0_1 = arith.constant 0 : index
    %c0_2 = arith.constant 0 : index
    %2 = vector.load %arg2[%c0_1, %c0_2] : memref<32x128xbf16, #tpu.memory_space<vmem>>, vector<32x128xbf16>
    %cst = arith.constant dense<0.000000e+00> : vector<48x128xf32>
    %3 = tpu.matmul %1, %2, %cst {dimension_numbers = #tpu.dot_dimension_numbers<[1], [0], [0], [1], [0, 0, 1, 1], [], []>} : vector<48x32xbf16>, vector<32x128xbf16>, vector<48x128xf32> -> vector<48x128xf32>
    %c0_3 = arith.constant 0 : index
    %c0_4 = arith.constant 0 : index
    %4 = vector.load %arg3[%c0_3, %c0_4] : memref<1x128xf32, #tpu.memory_space<vmem>>, vector<1x128xf32>
    %5 = vector.broadcast %4 : vector<1x128xf32> to vector<48x128xf32>
    %6 = arith.addf %3, %5 : vector<48x128xf32>
    %c0_5 = arith.constant 0 : index
    %c0_6 = arith.constant 0 : index
    %7 = vector.load %arg4[%c0_5, %c0_6] : memref<48x128xf32, #tpu.memory_space<vmem>>, vector<48x128xf32>
    tpu.vector_store %arg4[%c0_5, %c0_6], %6 {strides = array<i32>} : memref<48x128xf32, #tpu.memory_space<vmem>>, vector<48x128xf32>,
    return
  }
  func.func @transform_0(%arg0: i32) -> (i32, i32) {
    %c0_i32 = arith.constant 0 : i32
    %c0_i32_0 = arith.constant 0 : i32
    return %arg0, %c0_i32 : i32, i32
  }
  func.func @transform_1(%arg0: i32) -> (i32, i32) {
    %c0_i32 = arith.constant 0 : i32
    %c0_i32_0 = arith.constant 0 : i32
    %c0_i32_1 = arith.constant 0 : i32
    return %c0_i32, %c0_i32_0 : i32, i32
  }
  func.func @transform_2(%arg0: i32) -> (i32, i32) {
    %c0_i32 = arith.constant 0 : i32
    %c0_i32_0 = arith.constant 0 : i32
    %c0_i32_1 = arith.constant 0 : i32
    return %c0_i32, %c0_i32_0 : i32, i32
  }
  func.func @transform_3(%arg0: i32) -> (i32, i32) {
    %c0_i32 = arith.constant 0 : i32
    %c0_i32_0 = arith.constant 0 : i32
    return %arg0, %c0_i32 : i32, i32
  }
}

module attributes {stable_mosaic.version = 11 : i64} {
  func.func @_dense_ln_kernel(%arg0: i32, %arg1: memref<48x32xf32, #tpu.memory_space<vmem>>, %arg2: memref<1x32xf32, #tpu.memory_space<vmem>>, %arg3: memref<1x32xf32, #tpu.memory_space<vmem>>, %arg4: memref<32x128xbf16, #tpu.memory_space<vmem>>, %arg5: memref<1x128xf32, #tpu.memory_space<vmem>>, %arg6: memref<48x128xf32, #tpu.memory_space<vmem>>) attributes {dimension_semantics = [#tpu.dimension_semantics<parallel>], iteration_bounds = array<i64: 1>, scalar_prefetch = 0 : i64, scratch_operands = 0 : i64, tpu.core_type = #tpu.core_type<tc>, window_params = [{transform_indices = @transform_0, window_bounds = array<i64: 48, 32>}, {pipeline_mode = #tpu.pipeline_mode<synchronous>, transform_indices = @transform_1, window_bounds = array<i64: 1, 32>}, {pipeline_mode = #tpu.pipeline_mode<synchronous>, transform_indices = @transform_2, window_bounds = array<i64: 1, 32>}, {pipeline_mode = #tpu.pipeline_mode<synchronous>, transform_indices = @transform_3, window_bounds = array<i64: 32, 128>}, {pipeline_mode = #tpu.pipeline_mode<synchronous>, transform_indices = @transform_4, window_bounds = array<i64: 1, 128>}, {transform_indices = @transform_5, window_bounds = array<i64: 48, 128>}]} {
    %c0 = arith.constant 0 : index
    %c0_0 = arith.constant 0 : index
    %0 = vector.load %arg1[%c0, %c0_0] : memref<48x32xf32, #tpu.memory_space<vmem>>, vector<48x32xf32>
    %cst = arith.constant dense<0.000000e+00> : vector<48xf32>
    %1 = vector.multi_reduction <add>, %0, %cst [1] : vector<48x32xf32> to vector<48xf32>
    %2 = vector.shape_cast %1 : vector<48xf32> to vector<48x1xf32>
    %cst_1 = arith.constant 3.200000e+01 : f32
    %3 = vector.broadcast %cst_1 : f32 to vector<48x1xf32>
    %4 = arith.divf %2, %3 : vector<48x1xf32>
    %5 = vector.broadcast %4 : vector<48x1xf32> to vector<48x32xf32>
    %6 = arith.subf %0, %5 : vector<48x32xf32>
    %7 = arith.mulf %6, %6 : vector<48x32xf32>
    %cst_2 = arith.constant dense<0.000000e+00> : vector<48xf32>
    %8 = vector.multi_reduction <add>, %7, %cst_2 [1] : vector<48x32xf32> to vector<48xf32>
    %9 = vector.shape_cast %8 : vector<48xf32> to vector<48x1xf32>
    %cst_3 = arith.constant 3.200000e+01 : f32
    %10 = vector.broadcast %cst_3 : f32 to vector<48x1xf32>
    %11 = arith.divf %9, %10 : vector<48x1xf32>
    %12 = vector.broadcast %4 : vector<48x1xf32> to vector<48x32xf32>
    %13 = arith.subf %0, %12 : vector<48x32xf32>
    %cst_4 = arith.constant 9.99999997E-7 : f32
    %14 = vector.broadcast %cst_4 : f32 to vector<48x1xf32>
    %15 = arith.addf %11, %14 : vector<48x1xf32>
    %16 = math.rsqrt %15 : vector<48x1xf32>
    %17 = vector.broadcast %16 : vector<48x1xf32> to vector<48x32xf32>
    %18 = arith.mulf %13, %17 : vector<48x32xf32>
    %c0_5 = arith.constant 0 : index
    %c0_6 = arith.constant 0 : index
    %19 = vector.load %arg2[%c0_5, %c0_6] : memref<1x32xf32, #tpu.memory_space<vmem>>, vector<1x32xf32>
    %20 = vector.broadcast %19 : vector<1x32xf32> to vector<48x32xf32>
    %21 = arith.mulf %18, %20 : vector<48x32xf32>
    %c0_7 = arith.constant 0 : index
    %c0_8 = arith.constant 0 : index
    %22 = vector.load %arg3[%c0_7, %c0_8] : memref<1x32xf32, #tpu.memory_space<vmem>>, vector<1x32xf32>
    %23 = vector.broadcast %22 : vector<1x32xf32> to vector<48x32xf32>
    %24 = arith.addf %21, %23 : vector<48x32xf32>
    %25 = arith.truncf %24 : vector<48x32xf32> to vector<48x32xbf16>
    %c0_9 = arith.constant 0 : index
    %c0_10 = arith.constant 0 : index
    %26 = vector.load %arg4[%c0_9, %c0_10] : memref<32x128xbf16, #tpu.memory_space<vmem>>, vector<32x128xbf16>
    %cst_11 = arith.constant dense<0.000000e+00> : vector<48x128xf32>
    %27 = tpu.matmul %25, %26, %cst_11 {dimension_numbers = #tpu.dot_dimension_numbers<[1], [0], [0], [1], [0, 0, 1, 1], [], []>} : vector<48x32xbf16>, vector<32x128xbf16>, vector<48x128xf32> -> vector<48x128xf32>
    %c0_12 = arith.constant 0 : index
    %c0_13 = arith.constant 0 : index
    %28 = vector.load %arg5[%c0_12, %c0_13] : memref<1x128xf32, #tpu.memory_space<vmem>>, vector<1x128xf32>
    %29 = vector.broadcast %28 : vector<1x128xf32> to vector<48x128xf32>
    %30 = arith.addf %27, %29 : vector<48x128xf32>
    %cst_14 = arith.constant 5.000000e-01 : f32
    %31 = vector.broadcast %cst_14 : f32 to vector<48x128xf32>
    %32 = arith.mulf %31, %30 : vector<48x128xf32>
    %cst_15 = arith.constant 4.471500e-02 : f32
    %33 = vector.broadcast %cst_15 : f32 to vector<48x128xf32>
    %34 = arith.mulf %33, %30 : vector<48x128xf32>
    %35 = arith.mulf %34, %30 : vector<48x128xf32>
    %36 = arith.mulf %35, %30 : vector<48x128xf32>
    %37 = arith.addf %30, %36 : vector<48x128xf32>
    %cst_16 = arith.constant 0.797884583 : f32
    %38 = vector.broadcast %cst_16 : f32 to vector<48x128xf32>
    %39 = arith.mulf %38, %37 : vector<48x128xf32>
    %40 = math.tanh %39 : vector<48x128xf32>
    %cst_17 = arith.constant 1.000000e+00 : f32
    %41 = vector.broadcast %cst_17 : f32 to vector<48x128xf32>
    %42 = arith.addf %41, %40 : vector<48x128xf32>
    %43 = arith.mulf %32, %42 : vector<48x128xf32>
    %c0_18 = arith.constant 0 : index
    %c0_19 = arith.constant 0 : index
    %44 = vector.load %arg6[%c0_18, %c0_19] : memref<48x128xf32, #tpu.memory_space<vmem>>, vector<48x128xf32>
    tpu.vector_store %arg6[%c0_18, %c0_19], %43 {strides = array<i32>} : memref<48x128xf32, #tpu.memory_space<vmem>>, vector<48x128xf32>,
    return
  }
  func.func @transform_0(%arg0: i32) -> (i32, i32) {
    %c0_i32 = arith.constant 0 : i32
    %c0_i32_0 = arith.constant 0 : i32
    return %arg0, %c0_i32 : i32, i32
  }
  func.func @transform_1(%arg0: i32) -> (i32, i32) {
    %c0_i32 = arith.constant 0 : i32
    %c0_i32_0 = arith.constant 0 : i32
    %c0_i32_1 = arith.constant 0 : i32
    return %c0_i32, %c0_i32_0 : i32, i32
  }
  func.func @transform_2(%arg0: i32) -> (i32, i32) {
    %c0_i32 = arith.constant 0 : i32
    %c0_i32_0 = arith.constant 0 : i32
    %c0_i32_1 = arith.constant 0 : i32
    return %c0_i32, %c0_i32_0 : i32, i32
  }
  func.func @transform_3(%arg0: i32) -> (i32, i32) {
    %c0_i32 = arith.constant 0 : i32
    %c0_i32_0 = arith.constant 0 : i32
    %c0_i32_1 = arith.constant 0 : i32
    return %c0_i32, %c0_i32_0 : i32, i32
  }
  func.func @transform_4(%arg0: i32) -> (i32, i32) {
    %c0_i32 = arith.constant 0 : i32
    %c0_i32_0 = arith.constant 0 : i32
    %c0_i32_1 = arith.constant 0 : i32
    return %c0_i32, %c0_i32_0 : i32, i32
  }
  func.func @transform_5(%arg0: i32) -> (i32, i32) {
    %c0_i32 = arith.constant 0 : i32
    %c0_i32_0 = arith.constant 0 : i32
    return %arg0, %c0_i32 : i32, i32
  }
}

module attributes {stable_mosaic.version = 11 : i64} {
  func.func @_dense_kernel(%arg0: i32, %arg1: memref<48x128xf32, #tpu.memory_space<vmem>>, %arg2: memref<128x128xbf16, #tpu.memory_space<vmem>>, %arg3: memref<1x128xf32, #tpu.memory_space<vmem>>, %arg4: memref<48x128xf32, #tpu.memory_space<vmem>>) attributes {dimension_semantics = [#tpu.dimension_semantics<parallel>], iteration_bounds = array<i64: 1>, scalar_prefetch = 0 : i64, scratch_operands = 0 : i64, tpu.core_type = #tpu.core_type<tc>, window_params = [{transform_indices = @transform_0, window_bounds = array<i64: 48, 128>}, {pipeline_mode = #tpu.pipeline_mode<synchronous>, transform_indices = @transform_1, window_bounds = array<i64: 128, 128>}, {pipeline_mode = #tpu.pipeline_mode<synchronous>, transform_indices = @transform_2, window_bounds = array<i64: 1, 128>}, {transform_indices = @transform_3, window_bounds = array<i64: 48, 128>}]} {
    %c0 = arith.constant 0 : index
    %c0_0 = arith.constant 0 : index
    %0 = vector.load %arg1[%c0, %c0_0] : memref<48x128xf32, #tpu.memory_space<vmem>>, vector<48x128xf32>
    %1 = arith.truncf %0 : vector<48x128xf32> to vector<48x128xbf16>
    %c0_1 = arith.constant 0 : index
    %c0_2 = arith.constant 0 : index
    %2 = vector.load %arg2[%c0_1, %c0_2] : memref<128x128xbf16, #tpu.memory_space<vmem>>, vector<128x128xbf16>
    %cst = arith.constant dense<0.000000e+00> : vector<48x128xf32>
    %3 = tpu.matmul %1, %2, %cst {dimension_numbers = #tpu.dot_dimension_numbers<[1], [0], [0], [1], [0, 0, 1, 1], [], []>} : vector<48x128xbf16>, vector<128x128xbf16>, vector<48x128xf32> -> vector<48x128xf32>
    %c0_3 = arith.constant 0 : index
    %c0_4 = arith.constant 0 : index
    %4 = vector.load %arg3[%c0_3, %c0_4] : memref<1x128xf32, #tpu.memory_space<vmem>>, vector<1x128xf32>
    %5 = vector.broadcast %4 : vector<1x128xf32> to vector<48x128xf32>
    %6 = arith.addf %3, %5 : vector<48x128xf32>
    %c0_5 = arith.constant 0 : index
    %c0_6 = arith.constant 0 : index
    %7 = vector.load %arg4[%c0_5, %c0_6] : memref<48x128xf32, #tpu.memory_space<vmem>>, vector<48x128xf32>
    tpu.vector_store %arg4[%c0_5, %c0_6], %6 {strides = array<i32>} : memref<48x128xf32, #tpu.memory_space<vmem>>, vector<48x128xf32>,
    return
  }
  func.func @transform_0(%arg0: i32) -> (i32, i32) {
    %c0_i32 = arith.constant 0 : i32
    %c0_i32_0 = arith.constant 0 : i32
    return %arg0, %c0_i32 : i32, i32
  }
  func.func @transform_1(%arg0: i32) -> (i32, i32) {
    %c0_i32 = arith.constant 0 : i32
    %c0_i32_0 = arith.constant 0 : i32
    %c0_i32_1 = arith.constant 0 : i32
    return %c0_i32, %c0_i32_0 : i32, i32
  }
  func.func @transform_2(%arg0: i32) -> (i32, i32) {
    %c0_i32 = arith.constant 0 : i32
    %c0_i32_0 = arith.constant 0 : i32
    %c0_i32_1 = arith.constant 0 : i32
    return %c0_i32, %c0_i32_0 : i32, i32
  }
  func.func @transform_3(%arg0: i32) -> (i32, i32) {
    %c0_i32 = arith.constant 0 : i32
    %c0_i32_0 = arith.constant 0 : i32
    return %arg0, %c0_i32 : i32, i32
  }
}

module attributes {stable_mosaic.version = 11 : i64} {
  func.func @_ln_kernel(%arg0: i32, %arg1: memref<8x32xf32, #tpu.memory_space<vmem>>, %arg2: memref<1x32xf32, #tpu.memory_space<vmem>>, %arg3: memref<1x32xf32, #tpu.memory_space<vmem>>, %arg4: memref<8x32xf32, #tpu.memory_space<vmem>>) attributes {dimension_semantics = [#tpu.dimension_semantics<parallel>], iteration_bounds = array<i64: 1>, scalar_prefetch = 0 : i64, scratch_operands = 0 : i64, tpu.core_type = #tpu.core_type<tc>, window_params = [{transform_indices = @transform_0, window_bounds = array<i64: 8, 32>}, {pipeline_mode = #tpu.pipeline_mode<synchronous>, transform_indices = @transform_1, window_bounds = array<i64: 1, 32>}, {pipeline_mode = #tpu.pipeline_mode<synchronous>, transform_indices = @transform_2, window_bounds = array<i64: 1, 32>}, {transform_indices = @transform_3, window_bounds = array<i64: 8, 32>}]} {
    %c0 = arith.constant 0 : index
    %c0_0 = arith.constant 0 : index
    %0 = vector.load %arg1[%c0, %c0_0] : memref<8x32xf32, #tpu.memory_space<vmem>>, vector<8x32xf32>
    %cst = arith.constant dense<0.000000e+00> : vector<8xf32>
    %1 = vector.multi_reduction <add>, %0, %cst [1] : vector<8x32xf32> to vector<8xf32>
    %2 = vector.shape_cast %1 : vector<8xf32> to vector<8x1xf32>
    %cst_1 = arith.constant 3.200000e+01 : f32
    %3 = vector.broadcast %cst_1 : f32 to vector<8x1xf32>
    %4 = arith.divf %2, %3 : vector<8x1xf32>
    %5 = vector.broadcast %4 : vector<8x1xf32> to vector<8x32xf32>
    %6 = arith.subf %0, %5 : vector<8x32xf32>
    %7 = arith.mulf %6, %6 : vector<8x32xf32>
    %cst_2 = arith.constant dense<0.000000e+00> : vector<8xf32>
    %8 = vector.multi_reduction <add>, %7, %cst_2 [1] : vector<8x32xf32> to vector<8xf32>
    %9 = vector.shape_cast %8 : vector<8xf32> to vector<8x1xf32>
    %cst_3 = arith.constant 3.200000e+01 : f32
    %10 = vector.broadcast %cst_3 : f32 to vector<8x1xf32>
    %11 = arith.divf %9, %10 : vector<8x1xf32>
    %12 = vector.broadcast %4 : vector<8x1xf32> to vector<8x32xf32>
    %13 = arith.subf %0, %12 : vector<8x32xf32>
    %cst_4 = arith.constant 9.99999997E-7 : f32
    %14 = vector.broadcast %cst_4 : f32 to vector<8x1xf32>
    %15 = arith.addf %11, %14 : vector<8x1xf32>
    %16 = math.rsqrt %15 : vector<8x1xf32>
    %17 = vector.broadcast %16 : vector<8x1xf32> to vector<8x32xf32>
    %18 = arith.mulf %13, %17 : vector<8x32xf32>
    %c0_5 = arith.constant 0 : index
    %c0_6 = arith.constant 0 : index
    %19 = vector.load %arg2[%c0_5, %c0_6] : memref<1x32xf32, #tpu.memory_space<vmem>>, vector<1x32xf32>
    %20 = vector.broadcast %19 : vector<1x32xf32> to vector<8x32xf32>
    %21 = arith.mulf %18, %20 : vector<8x32xf32>
    %c0_7 = arith.constant 0 : index
    %c0_8 = arith.constant 0 : index
    %22 = vector.load %arg3[%c0_7, %c0_8] : memref<1x32xf32, #tpu.memory_space<vmem>>, vector<1x32xf32>
    %23 = vector.broadcast %22 : vector<1x32xf32> to vector<8x32xf32>
    %24 = arith.addf %21, %23 : vector<8x32xf32>
    %c0_9 = arith.constant 0 : index
    %c0_10 = arith.constant 0 : index
    %25 = vector.load %arg4[%c0_9, %c0_10] : memref<8x32xf32, #tpu.memory_space<vmem>>, vector<8x32xf32>
    tpu.vector_store %arg4[%c0_9, %c0_10], %24 {strides = array<i32>} : memref<8x32xf32, #tpu.memory_space<vmem>>, vector<8x32xf32>,
    return
  }
  func.func @transform_0(%arg0: i32) -> (i32, i32) {
    %c0_i32 = arith.constant 0 : i32
    %c0_i32_0 = arith.constant 0 : i32
    return %arg0, %c0_i32 : i32, i32
  }
  func.func @transform_1(%arg0: i32) -> (i32, i32) {
    %c0_i32 = arith.constant 0 : i32
    %c0_i32_0 = arith.constant 0 : i32
    %c0_i32_1 = arith.constant 0 : i32
    return %c0_i32, %c0_i32_0 : i32, i32
  }
  func.func @transform_2(%arg0: i32) -> (i32, i32) {
    %c0_i32 = arith.constant 0 : i32
    %c0_i32_0 = arith.constant 0 : i32
    %c0_i32_1 = arith.constant 0 : i32
    return %c0_i32, %c0_i32_0 : i32, i32
  }
  func.func @transform_3(%arg0: i32) -> (i32, i32) {
    %c0_i32 = arith.constant 0 : i32
    %c0_i32_0 = arith.constant 0 : i32
    return %arg0, %c0_i32 : i32, i32
  }
}

module attributes {stable_mosaic.version = 11 : i64} {
  func.func @_dense_ln_kernel(%arg0: i32, %arg1: memref<8x32xf32, #tpu.memory_space<vmem>>, %arg2: memref<1x32xf32, #tpu.memory_space<vmem>>, %arg3: memref<1x32xf32, #tpu.memory_space<vmem>>, %arg4: memref<32x128xbf16, #tpu.memory_space<vmem>>, %arg5: memref<1x128xf32, #tpu.memory_space<vmem>>, %arg6: memref<8x128xf32, #tpu.memory_space<vmem>>) attributes {dimension_semantics = [#tpu.dimension_semantics<parallel>], iteration_bounds = array<i64: 1>, scalar_prefetch = 0 : i64, scratch_operands = 0 : i64, tpu.core_type = #tpu.core_type<tc>, window_params = [{transform_indices = @transform_0, window_bounds = array<i64: 8, 32>}, {pipeline_mode = #tpu.pipeline_mode<synchronous>, transform_indices = @transform_1, window_bounds = array<i64: 1, 32>}, {pipeline_mode = #tpu.pipeline_mode<synchronous>, transform_indices = @transform_2, window_bounds = array<i64: 1, 32>}, {pipeline_mode = #tpu.pipeline_mode<synchronous>, transform_indices = @transform_3, window_bounds = array<i64: 32, 128>}, {pipeline_mode = #tpu.pipeline_mode<synchronous>, transform_indices = @transform_4, window_bounds = array<i64: 1, 128>}, {transform_indices = @transform_5, window_bounds = array<i64: 8, 128>}]} {
    %c0 = arith.constant 0 : index
    %c0_0 = arith.constant 0 : index
    %0 = vector.load %arg1[%c0, %c0_0] : memref<8x32xf32, #tpu.memory_space<vmem>>, vector<8x32xf32>
    %cst = arith.constant dense<0.000000e+00> : vector<8xf32>
    %1 = vector.multi_reduction <add>, %0, %cst [1] : vector<8x32xf32> to vector<8xf32>
    %2 = vector.shape_cast %1 : vector<8xf32> to vector<8x1xf32>
    %cst_1 = arith.constant 3.200000e+01 : f32
    %3 = vector.broadcast %cst_1 : f32 to vector<8x1xf32>
    %4 = arith.divf %2, %3 : vector<8x1xf32>
    %5 = vector.broadcast %4 : vector<8x1xf32> to vector<8x32xf32>
    %6 = arith.subf %0, %5 : vector<8x32xf32>
    %7 = arith.mulf %6, %6 : vector<8x32xf32>
    %cst_2 = arith.constant dense<0.000000e+00> : vector<8xf32>
    %8 = vector.multi_reduction <add>, %7, %cst_2 [1] : vector<8x32xf32> to vector<8xf32>
    %9 = vector.shape_cast %8 : vector<8xf32> to vector<8x1xf32>
    %cst_3 = arith.constant 3.200000e+01 : f32
    %10 = vector.broadcast %cst_3 : f32 to vector<8x1xf32>
    %11 = arith.divf %9, %10 : vector<8x1xf32>
    %12 = vector.broadcast %4 : vector<8x1xf32> to vector<8x32xf32>
    %13 = arith.subf %0, %12 : vector<8x32xf32>
    %cst_4 = arith.constant 9.99999974E-6 : f32
    %14 = vector.broadcast %cst_4 : f32 to vector<8x1xf32>
    %15 = arith.addf %11, %14 : vector<8x1xf32>
    %16 = math.rsqrt %15 : vector<8x1xf32>
    %17 = vector.broadcast %16 : vector<8x1xf32> to vector<8x32xf32>
    %18 = arith.mulf %13, %17 : vector<8x32xf32>
    %c0_5 = arith.constant 0 : index
    %c0_6 = arith.constant 0 : index
    %19 = vector.load %arg2[%c0_5, %c0_6] : memref<1x32xf32, #tpu.memory_space<vmem>>, vector<1x32xf32>
    %20 = vector.broadcast %19 : vector<1x32xf32> to vector<8x32xf32>
    %21 = arith.mulf %18, %20 : vector<8x32xf32>
    %c0_7 = arith.constant 0 : index
    %c0_8 = arith.constant 0 : index
    %22 = vector.load %arg3[%c0_7, %c0_8] : memref<1x32xf32, #tpu.memory_space<vmem>>, vector<1x32xf32>
    %23 = vector.broadcast %22 : vector<1x32xf32> to vector<8x32xf32>
    %24 = arith.addf %21, %23 : vector<8x32xf32>
    %25 = arith.truncf %24 : vector<8x32xf32> to vector<8x32xbf16>
    %c0_9 = arith.constant 0 : index
    %c0_10 = arith.constant 0 : index
    %26 = vector.load %arg4[%c0_9, %c0_10] : memref<32x128xbf16, #tpu.memory_space<vmem>>, vector<32x128xbf16>
    %cst_11 = arith.constant dense<0.000000e+00> : vector<8x128xf32>
    %27 = tpu.matmul %25, %26, %cst_11 {dimension_numbers = #tpu.dot_dimension_numbers<[1], [0], [0], [1], [0, 0, 1, 1], [], []>} : vector<8x32xbf16>, vector<32x128xbf16>, vector<8x128xf32> -> vector<8x128xf32>
    %c0_12 = arith.constant 0 : index
    %c0_13 = arith.constant 0 : index
    %28 = vector.load %arg5[%c0_12, %c0_13] : memref<1x128xf32, #tpu.memory_space<vmem>>, vector<1x128xf32>
    %29 = vector.broadcast %28 : vector<1x128xf32> to vector<8x128xf32>
    %30 = arith.addf %27, %29 : vector<8x128xf32>
    %c0_14 = arith.constant 0 : index
    %c0_15 = arith.constant 0 : index
    %31 = vector.load %arg6[%c0_14, %c0_15] : memref<8x128xf32, #tpu.memory_space<vmem>>, vector<8x128xf32>
    tpu.vector_store %arg6[%c0_14, %c0_15], %30 {strides = array<i32>} : memref<8x128xf32, #tpu.memory_space<vmem>>, vector<8x128xf32>,
    return
  }
  func.func @transform_0(%arg0: i32) -> (i32, i32) {
    %c0_i32 = arith.constant 0 : i32
    %c0_i32_0 = arith.constant 0 : i32
    return %arg0, %c0_i32 : i32, i32
  }
  func.func @transform_1(%arg0: i32) -> (i32, i32) {
    %c0_i32 = arith.constant 0 : i32
    %c0_i32_0 = arith.constant 0 : i32
    %c0_i32_1 = arith.constant 0 : i32
    return %c0_i32, %c0_i32_0 : i32, i32
  }
  func.func @transform_2(%arg0: i32) -> (i32, i32) {
    %c0_i32 = arith.constant 0 : i32
    %c0_i32_0 = arith.constant 0 : i32
    %c0_i32_1 = arith.constant 0 : i32
    return %c0_i32, %c0_i32_0 : i32, i32
  }
  func.func @transform_3(%arg0: i32) -> (i32, i32) {
    %c0_i32 = arith.constant 0 : i32
    %c0_i32_0 = arith.constant 0 : i32
    %c0_i32_1 = arith.constant 0 : i32
    return %c0_i32, %c0_i32_0 : i32, i32
  }
  func.func @transform_4(%arg0: i32) -> (i32, i32) {
    %c0_i32 = arith.constant 0 : i32
    %c0_i32_0 = arith.constant 0 : i32
    %c0_i32_1 = arith.constant 0 : i32
    return %c0_i32, %c0_i32_0 : i32, i32
  }
  func.func @transform_5(%arg0: i32) -> (i32, i32) {
    %c0_i32 = arith.constant 0 : i32
    %c0_i32_0 = arith.constant 0 : i32
    return %arg0, %c0_i32 : i32, i32
  }
}

</mosaic_0001>

<bundles_post_ra>
// kernel: _lambda_.25
= control target key start
LH: loop header
LB: loop body
LE: loop exit
PB: predicated region body
PF: predicated region fallthrough
CT: control target
= control target key end

     0   :  { %vm72_vm0 = vcmask 523264   ;;  %s225_s1 = inlined_call_operand.vmem [shape: bf16[64,128], index: 1, kind: input, shape index: {}]   ;;  %s226_s2 = inlined_call_operand.vmem [shape: f32[1,128], index: 2, kind: input, shape index: {}]   ;;  %s227_s0 = inlined_call_operand.vmem [shape: bf16[48,64], index: 0, kind: input, shape index: {}]   ;;  %s228_s3 = inlined_call_operand.vmem [shape: f32[48,128], index: 3, kind: output, shape index: {}]  }
   0x1   :  { %v153_v0 = vld [vmem:[%s225_s1 + $0x18] sm:$0xff]  ;;  %v152_v1 = vld [vmem:[%s225_s1 + $0x10] sm:$0xff]  ;;  %v151_v2 = vld [vmem:[%s225_s1 + $0x8] sm:$0xff] }
   0x2   :  { %86 = vmatpush.bf16.msra.mxu0 %v153_v0  ;;  %154 = vmatpush.bf16.msra.mxu1 %v153_v0  ;;  %v150_v3 = vld [vmem:[%s225_s1] sm:$0xff]  ;;  %v148_v5 = vld [vmem:[%s227_s0 + $0x8] sm:$0xff]  ;;  %v149_v6 = vld [vmem:[%s227_s0 + $0x10] sm:$0xff] }
   0x3   :  { %155 = vmatpush.bf16.msra.mxu2 %v153_v0  ;;  %v147_v4 = vld [vmem:[%s227_s0] sm:$0xff] }
   0x4   :  { %v162_v7 = vld [vmem:[%s226_s2] ss:$0 sm:$0xff] }
   0x6   :  { %87 = vmatpush.bf16.msra.mxu0 %v152_v1  ;;  %156 = vmatpush.bf16.msra.mxu1 %v152_v1 }
   0x7   :  { %157 = vmatpush.bf16.msra.mxu2 %v152_v1 }
   0xa   :  { %88 = vmatpush.bf16.msra.mxu0 %v151_v2  ;;  %158 = vmatpush.bf16.msra.mxu1 %v151_v2 }
   0xb   :  { %159 = vmatpush.bf16.msra.mxu2 %v151_v2 }
   0xe   :  { %89 = vmatpush.bf16.msra.mxu0 %v150_v3  ;;  %160 = vmatpush.bf16.msra.mxu1 %v150_v3 }
   0xf   :  { %161 = vmatpush.bf16.msra.mxu2 %v150_v3 }
  0x11   :  { %144 = vmatmul.msk.bf16.vlgmr.msra.gmra.mxu0 %vm72_vm0, %v147_v4  ;;  %145 = vmatmul.msk.bf16.vlgmr.msra.gmra.mxu1 %vm72_vm0, %v148_v5 }
  0x12   :  { %146 = vmatmul.msk.bf16.vlgmr.msra.gmra.mxu2 %vm72_vm0, %v149_v6 }
  0x8e   :  { %v91_v8 = vpop.f32.mrf.mxu0  ;;  %v96_v9 = vpop.f32.mrf.mxu1 }
  0x8f   :  { %v92_v10 = vadd.f32 %v162_v7, %v91_v8  ;;  %v97_v11 = vadd.f32 %v162_v7, %v96_v9 }
  0x91   :  { %106 = vst [vmem:[%s228_s3] sm:$0xff] %v92_v10 }
  0x92   :  { %108 = vst [vmem:[%s228_s3 + $0x10] sm:$0xff] %v97_v11 }
  0x95   :  { %v101_v12 = vpop.f32.mrf.mxu2 }
  0x96   :  { %v102_v13 = vadd.f32 %v162_v7, %v101_v12  ;;  %v93_v14 = vpop.f32.mrf.mxu0  ;;  %v98_v15 = vpop.f32.mrf.mxu1 }
  0x97   :  { %v94_v16 = vadd.f32 %v162_v7, %v93_v14  ;;  %v99_v17 = vadd.f32 %v162_v7, %v98_v15 }
  0x98   :  { %110 = vst [vmem:[%s228_s3 + $0x20] sm:$0xff] %v102_v13 }
  0x99   :  { %107 = vst [vmem:[%s228_s3 + $0x8] sm:$0xff] %v94_v16 }
  0x9a   :  { %109 = vst [vmem:[%s228_s3 + $0x18] sm:$0xff] %v99_v17 }
  0x9d   :  { %v103_v18 = vpop.f32.mrf.mxu2 }
  0x9e   :  { %v104_v19 = vadd.f32 %v162_v7, %v103_v18 }
  0xa0   :  { %111 = vst [vmem:[%s228_s3 + $0x28] sm:$0xff] %v104_v19 }

// kernel: _lambda_.26
= control target key start
LH: loop header
LB: loop body
LE: loop exit
PB: predicated region body
PF: predicated region fallthrough
CT: control target
= control target key end

     0   :  { %vm27_vm0 = vcmask 261120   ;;  %v288_v12 = vmov 32.0   ;;  %s443_s0 = inlined_call_operand.vmem [shape: f32[48,32], index: 0, kind: input, shape index: {}]   ;;  %s444_s1 = inlined_call_operand.vmem [shape: f32[1,32], index: 1, kind: input, shape index: {}]   ;;  %s445_s2 = inlined_call_operand.vmem [shape: f32[1,32], index: 2, kind: input, shape index: {}]   ;;  %s446_s4 = inlined_call_operand.vmem [shape: f32[1,128], index: 4, kind: input, shape index: {}]   ;;  %s447_s3 = inlined_call_operand.vmem [shape: bf16[32,128], index: 3, kind: input, shape index: {}]   ;;  %s448_s5 = inlined_call_operand.vmem [shape: f32[48,128], index: 5, kind: output, shape index: {}]  }
   0x1   :  { %v25_v0 = vld [vmem:[%s443_s0 + $0x20] sm:$0xff]  ;;  %v23_v1 = vld [vmem:[%s443_s0 + $0x10] sm:$0xff]  ;;  %v26_v6 = vld [vmem:[%s443_s0 + $0x28] sm:$0xff]  ;;  %274 = vrcp.f32 %v288_v12 }
   0x2   :  { %v21_v2 = vld [vmem:[%s443_s0] sm:$0xff]  ;;  %v40_v3 = vsel %vm27_vm0, %v25_v0, 0.0  ;;  %v34_v4 = vsel %vm27_vm0, %v23_v1, 0.0  ;;  %v24_v7 = vld [vmem:[%s443_s0 + $0x18] sm:$0xff]  ;;  %v22_v8 = vld [vmem:[%s443_s0 + $0x8] sm:$0xff]  ;;  %v43_v9 = vsel %vm27_vm0, %v26_v6, 0.0 }
   0x3   :  { %v28_v5 = vsel %vm27_vm0, %v21_v2, 0.0  ;;  %41 = vadd.xlane.f32.xlu0 %v40_v3  ;;  %35 = vadd.xlane.f32.xlu2 %v34_v4  ;;  %v37_v10 = vsel %vm27_vm0, %v24_v7, 0.0  ;;  %v31_v11 = vsel %vm27_vm0, %v22_v8, 0.0  ;;  %v265_v50 = vld [vmem:[%s447_s3 + $0x8] sm:$0xff]  ;;  %v264_v56 = vld [vmem:[%s447_s3] sm:$0xff] }
   0x4   :  { %29 = vadd.xlane.f32.xlu1 %v28_v5  ;;  %225 = vmatpush.bf16.msra.mxu0 %v265_v50 }
   0x5   :  { %267 = vmatpush.bf16.msra.mxu2 %v265_v50  ;;  %266 = vmatpush.bf16.msra.mxu1 %v265_v50 }
   0x7   :  { %v275_v13 = vpop.eup %274 }
   0x8   :  { %v47_v14 = vmul.f32 32.0, %v275_v13  ;;  %vm51_vm1 = vweird.f32 %v275_v13  ;;  %226 = vmatpush.bf16.msra.mxu0 %v264_v56 }
   0x9   :  { %269 = vmatpush.bf16.msra.mxu2 %v264_v56  ;;  %268 = vmatpush.bf16.msra.mxu1 %v264_v56 }
   0xa   :  { %v48_v15 = vsub.f32 1.0, %v47_v14 }
   0xb   :  { %44 = vadd.xlane.f32.xlu0 %v43_v9  ;;  %38 = vadd.xlane.f32.xlu2 %v37_v10 }
   0xc   :  { %32 = vadd.xlane.f32.xlu1 %v31_v11  ;;  %v49_v16 = vmul.f32 %v275_v13, %v48_v15 }
   0xe   :  { %v50_v17 = vadd.f32 %v275_v13, %v49_v16 }
  0x10   :  { %v343_v18 = vsel %vm51_vm1, %v275_v13, %v50_v17 }
  0x76   :  { %v42_v19 = vpop.xlane.xlu0 %41  ;;  %v36_v20 = vpop.xlane.xlu2 %35 }
  0x77   :  { %v57_v21 = vmul.f32 %v343_v18, %v42_v19  ;;  %v30_v22 = vpop.xlane.xlu1 %29  ;;  %v55_v36 = vmul.f32 %v343_v18, %v36_v20 }
  0x78   :  { %v53_v23 = vmul.f32 %v343_v18, %v30_v22 }
  0x79   :  { %v347_v24 = vsub.f32 %v25_v0, %v57_v21  ;;  %v373_v43 = vsub.f32 %v23_v1, %v55_v36 }
  0x7a   :  { %v349_v25 = vsub.f32 %v21_v2, %v53_v23 }
  0x7b   :  { %v69_v26 = vmul.f32 %v347_v24, %v347_v24  ;;  %v67_v47 = vmul.f32 %v373_v43, %v373_v43 }
  0x7c   :  { %v65_v27 = vmul.f32 %v349_v25, %v349_v25 }
  0x7d   :  { %v83_v28 = vsel %vm27_vm0, %v69_v26, 0.0  ;;  %v77_v48 = vsel %vm27_vm0, %v67_v47, 0.0 }
  0x7e   :  { %84 = vadd.xlane.f32.xlu0 %v83_v28  ;;  %v45_v29 = vpop.xlane.xlu0 %44  ;;  %v39_v30 = vpop.xlane.xlu2 %38  ;;  %v71_v31 = vsel %vm27_vm0, %v65_v27, 0.0 }
  0x7f   :  { %v58_v32 = vmul.f32 %v343_v18, %v45_v29  ;;  %v56_v33 = vmul.f32 %v343_v18, %v39_v30  ;;  %72 = vadd.xlane.f32.xlu2 %v71_v31  ;;  %v33_v34 = vpop.xlane.xlu1 %32 }
  0x80   :  { %v54_v35 = vmul.f32 %v343_v18, %v33_v34 }
  0x81   :  { %v361_v37 = vsub.f32 %v26_v6, %v58_v32  ;;  %v363_v38 = vsub.f32 %v24_v7, %v56_v33 }
  0x82   :  { %v365_v39 = vsub.f32 %v22_v8, %v54_v35 }
  0x83   :  { %v70_v40 = vmul.f32 %v361_v37, %v361_v37  ;;  %v68_v41 = vmul.f32 %v363_v38, %v363_v38 }
  0x84   :  { %v66_v42 = vmul.f32 %v365_v39, %v365_v39 }
  0x85   :  { %v86_v44 = vsel %vm27_vm0, %v70_v40, 0.0  ;;  %v80_v45 = vsel %vm27_vm0, %v68_v41, 0.0  ;;  %v271_v41 = vld [vmem:[%s444_s1] ss:$0 sm:$0xff] }
  0x86   :  { %87 = vadd.xlane.f32.xlu1 %v86_v44  ;;  %v74_v46 = vsel %vm27_vm0, %v66_v42, 0.0 }
  0x87   :  { %81 = vadd.xlane.f32.xlu2 %v80_v45  ;;  %75 = vadd.xlane.f32.xlu0 %v74_v46 }
  0x8e   :  { %78 = vadd.xlane.f32.xlu1 %v77_v48 }
  0xf1   :  { %v85_v49 = vpop.xlane.xlu0 %84 }
  0xf2   :  { %v93_v51 = vmul.f32 %v85_v49, %v343_v18  ;;  %v73_v52 = vpop.xlane.xlu2 %72 }
  0xf3   :  { %v89_v53 = vmul.f32 %v73_v52, %v343_v18  ;;  %v272_v52 = vld [vmem:[%s445_s2] ss:$0 sm:$0xff] }
  0xf4   :  { %v99_v54 = vadd.f32 1e-06, %v93_v51 }
  0xf5   :  { %v95_v55 = vadd.f32 1e-06, %v89_v53 }
  0xf6   :  { %276 = vrsqrt.f32 %v99_v54  ;;  %vm147_vm3 = vweird.f32 %v99_v54 }
  0xf7   :  { %278 = vrsqrt.f32 %v95_v55  ;;  %vm107_vm4 = vweird.f32 %v95_v55 }
  0xf9   :  { %v88_v57 = vpop.xlane.xlu1 %87 }
  0xfa   :  { %v82_v58 = vpop.xlane.xlu2 %81  ;;  %v76_v59 = vpop.xlane.xlu0 %75  ;;  %v94_v60 = vmul.f32 %v88_v57, %v343_v18 }
  0xfb   :  { %v92_v61 = vmul.f32 %v82_v58, %v343_v18  ;;  %v90_v62 = vmul.f32 %v76_v59, %v343_v18 }
  0xfc   :  { %v277_v63 = vpop.eup %276  ;;  %v100_v0 = vadd.f32 1e-06, %v94_v60 }
  0xfd   :  { %v279_v1 = vpop.eup %278  ;;  %v142_v2 = vmul.f32 %v277_v63, %v99_v54  ;;  %v98_v3 = vadd.f32 1e-06, %v92_v61  ;;  %v96_v4 = vadd.f32 1e-06, %v90_v62  ;;  %vm148_vm2 = vweird.f32 %v277_v63 }
  0xfe   :  { %v102_v5 = vmul.f32 %v279_v1, %v95_v55  ;;  %280 = vrsqrt.f32 %v100_v0  ;;  %vm108_vm5 = vweird.f32 %v279_v1  ;;  %vm149_vm6 = vmor %vm147_vm3, %vm148_vm2  ;;  %vm157_vm9 = vweird.f32 %v100_v0 }
  0xff   :  { %v143_v6 = vmul.f32 %v277_v63, %v142_v2  ;;  %282 = vrsqrt.f32 %v98_v3  ;;  %vm393_vm7 = vmor %vm107_vm4, %vm108_vm5  ;;  %vm137_vm8 = vweird.f32 %v98_v3  ;;  %vm117_vm12 = vweird.f32 %v96_v4 }
 0x100   :  { %v103_v7 = vmul.f32 %v279_v1, %v102_v5  ;;  %284 = vrsqrt.f32 %v96_v4 }
 0x101   :  { %v144_v8 = vmul.f32 0.5, %v143_v6  ;;  %v79_v9 = vpop.xlane.xlu1 %78 }
 0x102   :  { %v104_v10 = vmul.f32 0.5, %v103_v7  ;;  %v91_v11 = vmul.f32 %v79_v9, %v343_v18  ;;  %v273_v9 = vld [vmem:[%s446_s4] ss:$0 sm:$0xff] }
 0x103   :  { %v145_v12 = vsub.f32 1.5, %v144_v8 }
 0x104   :  { %v281_v13 = vpop.eup %280  ;;  %v105_v14 = vsub.f32 1.5, %v104_v10  ;;  %v97_v15 = vadd.f32 1e-06, %v91_v11 }
 0x105   :  { %v283_v16 = vpop.eup %282  ;;  %v146_v17 = vmul.f32 %v277_v63, %v145_v12  ;;  %v152_v19 = vmul.f32 %v281_v13, %v100_v0  ;;  %vm158_vm10 = vweird.f32 %v281_v13 }
 0x106   :  { %v285_v20 = vpop.eup %284  ;;  %v132_v21 = vmul.f32 %v283_v16, %v98_v3  ;;  %286 = vrsqrt.f32 %v97_v15  ;;  %v106_v22 = vmul.f32 %v279_v1, %v105_v14  ;;  %vm138_vm11 = vweird.f32 %v283_v16  ;;  %vm159_vm14 = vmor %vm157_vm9, %vm158_vm10 }
 0x107   :  { %v112_v23 = vmul.f32 %v285_v20, %v96_v4  ;;  %v153_v26 = vmul.f32 %v281_v13, %v152_v19  ;;  %v150_v18 = vsel %vm149_vm6, %v277_v63, %v146_v17  ;;  %vm118_vm13 = vweird.f32 %v285_v20  ;;  %vm406_vm15 = vmor %vm137_vm8, %vm138_vm11 }
 0x108   :  { %v133_v27 = vmul.f32 %v283_v16, %v132_v21  ;;  %v110_v32 = vsel %vm393_vm7, %v279_v1, %v106_v22  ;;  %v165_v36 = vmul.f32 %v150_v18, %v347_v24  ;;  %vm119_vm1 = vmor %vm117_vm12, %vm118_vm13  ;;  %vm127_vm3 = vweird.f32 %v97_v15 }
 0x109   :  { %v113_v28 = vmul.f32 %v285_v20, %v112_v23  ;;  %v154_v29 = vmul.f32 0.5, %v153_v26  ;;  %v161_v46 = vmul.f32 %v110_v32, %v349_v25 }
 0x10a   :  { %v134_v31 = vmul.f32 0.5, %v133_v27  ;;  %v175_v53 = vmul.f32 %v271_v41, %v165_v36 }
 0x10b   :  { %v114_v33 = vmul.f32 0.5, %v113_v28  ;;  %v155_v34 = vsub.f32 1.5, %v154_v29  ;;  %v171_v57 = vmul.f32 %v271_v41, %v161_v46 }
 0x10c   :  { %v287_v35 = vpop.eup %286  ;;  %v135_v40 = vsub.f32 1.5, %v134_v31 }
 0x10d   :  { %v115_v42 = vsub.f32 1.5, %v114_v33  ;;  %v156_v44 = vmul.f32 %v281_v13, %v155_v34  ;;  %v122_v45 = vmul.f32 %v287_v35, %v97_v15  ;;  %vm128_vm2 = vweird.f32 %v287_v35 }
 0x10e   :  { %v136_v47 = vmul.f32 %v283_v16, %v135_v40  ;;  %vm129_vm4 = vmor %vm127_vm3, %vm128_vm2  ;;  %v181_v0 = vadd.f32 %v272_v52, %v171_v57 }
 0x10f   :  { %v116_v24 = vmul.f32 %v285_v20, %v115_v42  ;;  %v160_v49 = vsel %vm159_vm14, %v281_v13, %v156_v44  ;;  %v123_v50 = vmul.f32 %v287_v35, %v122_v45 }
 0x110   :  { %v166_v51 = vmul.f32 %v160_v49, %v361_v37  ;;  %v140_v25 = vsel %vm406_vm15, %v283_v16, %v136_v47  ;;  %v185_v37 = vadd.f32 %v272_v52, %v175_v53 }
 0x111   :  { %v120_v54 = vsel %vm119_vm1, %v285_v20, %v116_v24  ;;  %v124_v55 = vmul.f32 0.5, %v123_v50  ;;  %v164_v60 = vmul.f32 %v140_v25, %v363_v38 }
 0x112   :  { %v162_v56 = vmul.f32 %v120_v54, %v365_v39  ;;  %v176_v58 = vmul.f32 %v271_v41, %v166_v51 }
 0x113   :  { %v125_v59 = vsub.f32 1.5, %v124_v55  ;;  %v174_v39 = vmul.f32 %v271_v41, %v164_v60 }
 0x114   :  { %v172_v61 = vmul.f32 %v271_v41, %v162_v56  ;;  %v186_v62 = vadd.f32 %v272_v52, %v176_v58 }
 0x115   :  { %v126_v63 = vmul.f32 %v287_v35, %v125_v59  ;;  %v184_v7 = vadd.f32 %v272_v52, %v174_v39 }
 0x116   :  { %v182_v1 = vadd.f32 %v272_v52, %v172_v61  ;;  %v189_v2 = vpack.c.bf16 %v186_v62, %v185_v37 }
 0x117   :  { %v130_v3 = vsel %vm129_vm4, %v287_v35, %v126_v63 }
 0x118   :  { %v163_v4 = vmul.f32 %v130_v3, %v373_v43  ;;  %v187_v5 = vpack.c.bf16 %v182_v1, %v181_v0  ;;  %263 = vmatmul.msk.bf16.vlgmr.msra.gmra.mxu2 %vm27_vm0, %v189_v2 }
 0x11a   :  { %261 = vmatmul.msk.bf16.vlgmr.msra.gmra.mxu0 %vm27_vm0, %v187_v5  ;;  %v173_v6 = vmul.f32 %v271_v41, %v163_v4 }
 0x11c   :  { %v183_v38 = vadd.f32 %v272_v52, %v173_v6 }
 0x11e   :  { %v188_v8 = vpack.c.bf16 %v184_v7, %v183_v38 }
 0x120   :  { %262 = vmatmul.msk.bf16.vlgmr.msra.gmra.mxu1 %vm27_vm0, %v188_v8 }
 0x197   :  { %v228_v10 = vpop.f32.mrf.mxu0 }
 0x198   :  { %v229_v11 = vadd.f32 %v273_v9, %v228_v10 }
 0x19a   :  { %243 = vst [vmem:[%s448_s5] sm:$0xff] %v229_v11 }
 0x19b   :  { %v238_v43 = vpop.f32.mrf.mxu2 }
 0x19c   :  { %v239_v12 = vadd.f32 %v273_v9, %v238_v43 }
 0x19d   :  { %v233_v13 = vpop.f32.mrf.mxu1 }
 0x19e   :  { %247 = vst [vmem:[%s448_s5 + $0x20] sm:$0xff] %v239_v12  ;;  %v234_v14 = vadd.f32 %v273_v9, %v233_v13 }
 0x19f   :  { %v230_v15 = vpop.f32.mrf.mxu0 }
 0x1a0   :  { %v231_v16 = vadd.f32 %v273_v9, %v230_v15  ;;  %245 = vst [vmem:[%s448_s5 + $0x10] sm:$0xff] %v234_v14 }
 0x1a2   :  { %244 = vst [vmem:[%s448_s5 + $0x8] sm:$0xff] %v231_v16 }
 0x1a3   :  { %v240_v17 = vpop.f32.mrf.mxu2 }
 0x1a4   :  { %v241_v19 = vadd.f32 %v273_v9, %v240_v17 }
 0x1a5   :  { %v235_v20 = vpop.f32.mrf.mxu1 }
 0x1a6   :  { %248 = vst [vmem:[%s448_s5 + $0x28] sm:$0xff] %v241_v19  ;;  %v236_v21 = vadd.f32 %v273_v9, %v235_v20 }
 0x1a8   :  { %246 = vst [vmem:[%s448_s5 + $0x18] sm:$0xff] %v236_v21 }

// kernel: _lambda_.28
= control target key start
LH: loop header
LB: loop body
LE: loop exit
PB: predicated region body
PF: predicated region fallthrough
CT: control target
= control target key end

     0   :  { %vm44_vm0 = vcmask 261120   ;;  %s171_s1 = inlined_call_operand.vmem [shape: bf16[32,128], index: 1, kind: input, shape index: {}]   ;;  %s172_s0 = inlined_call_operand.vmem [shape: f32[48,32], index: 0, kind: input, shape index: {}]   ;;  %s173_s2 = inlined_call_operand.vmem [shape: f32[1,128], index: 2, kind: input, shape index: {}]   ;;  %s174_s3 = inlined_call_operand.vmem [shape: f32[48,128], index: 3, kind: output, shape index: {}]  }
   0x1   :  { %v100_v0 = vld [vmem:[%s171_s1 + $0x8] sm:$0xff]  ;;  %v99_v1 = vld [vmem:[%s171_s1] sm:$0xff]  ;;  %v17_v4 = vld [vmem:[%s172_s0 + $0x10] sm:$0xff] }
   0x2   :  { %v15_v2 = vld [vmem:[%s172_s0] sm:$0xff]  ;;  %v16_v3 = vld [vmem:[%s172_s0 + $0x8] sm:$0xff]  ;;  %60 = vmatpush.bf16.msra.mxu0 %v100_v0  ;;  %101 = vmatpush.bf16.msra.mxu1 %v100_v0  ;;  %v18_v5 = vld [vmem:[%s172_s0 + $0x18] sm:$0xff] }
   0x3   :  { %102 = vmatpush.bf16.msra.mxu2 %v100_v0  ;;  %v19_v6 = vld [vmem:[%s172_s0 + $0x20] sm:$0xff]  ;;  %v20_v7 = vld [vmem:[%s172_s0 + $0x28] sm:$0xff]  ;;  %v21_v8 = vpack.c.bf16 %v16_v3, %v15_v2  ;;  %v22_v9 = vpack.c.bf16 %v18_v5, %v17_v4 }
   0x4   :  { %v23_v10 = vpack.c.bf16 %v20_v7, %v19_v6  ;;  %v105_v11 = vld [vmem:[%s173_s2] ss:$0 sm:$0xff] }
   0x6   :  { %61 = vmatpush.bf16.msra.mxu0 %v99_v1  ;;  %103 = vmatpush.bf16.msra.mxu1 %v99_v1 }
   0x7   :  { %104 = vmatpush.bf16.msra.mxu2 %v99_v1 }
   0x9   :  { %96 = vmatmul.msk.bf16.vlgmr.msra.gmra.mxu0 %vm44_vm0, %v21_v8  ;;  %97 = vmatmul.msk.bf16.vlgmr.msra.gmra.mxu1 %vm44_vm0, %v22_v9 }
   0xa   :  { %98 = vmatmul.msk.bf16.vlgmr.msra.gmra.mxu2 %vm44_vm0, %v23_v10 }
  0x86   :  { %v63_v12 = vpop.f32.mrf.mxu0  ;;  %v68_v13 = vpop.f32.mrf.mxu1 }
  0x87   :  { %v64_v14 = vadd.f32 %v105_v11, %v63_v12  ;;  %v69_v15 = vadd.f32 %v105_v11, %v68_v13 }
  0x89   :  { %78 = vst [vmem:[%s174_s3] sm:$0xff] %v64_v14 }
  0x8a   :  { %80 = vst [vmem:[%s174_s3 + $0x10] sm:$0xff] %v69_v15 }
  0x8d   :  { %v73_v16 = vpop.f32.mrf.mxu2 }
  0x8e   :  { %v74_v17 = vadd.f32 %v105_v11, %v73_v16  ;;  %v65_v18 = vpop.f32.mrf.mxu0  ;;  %v70_v19 = vpop.f32.mrf.mxu1 }
  0x8f   :  { %v66_v20 = vadd.f32 %v105_v11, %v65_v18  ;;  %v71_v21 = vadd.f32 %v105_v11, %v70_v19 }
  0x90   :  { %82 = vst [vmem:[%s174_s3 + $0x20] sm:$0xff] %v74_v17 }
  0x91   :  { %79 = vst [vmem:[%s174_s3 + $0x8] sm:$0xff] %v66_v20 }
  0x92   :  { %81 = vst [vmem:[%s174_s3 + $0x18] sm:$0xff] %v71_v21 }
  0x95   :  { %v75_v22 = vpop.f32.mrf.mxu2 }
  0x96   :  { %v76_v23 = vadd.f32 %v105_v11, %v75_v22 }
  0x98   :  { %83 = vst [vmem:[%s174_s3 + $0x28] sm:$0xff] %v76_v23 }

// kernel: _lambda_.27
= control target key start
LH: loop header
LB: loop body
LE: loop exit
PB: predicated region body
PF: predicated region fallthrough
CT: control target
= control target key end

     0   :  { %s548_s12 = smov 0   ;;  %s600_s0 = inlined_call_operand.vmem [shape: bf16[4,23,16], index: 0, kind: input, shape index: {}]   ;;  %s601_s1 = inlined_call_operand.vmem [shape: bf16[4,16,23], index: 1, kind: input, shape index: {}]   ;;  %s602_s2 = inlined_call_operand.vmem [shape: bf16[4,23,16], index: 2, kind: input, shape index: {}]   ;;  %s603_s3 = inlined_call_operand.vmem [shape: f32[4,23,16], index: 3, kind: output, shape index: {}]  }
   0x1 LB: > { %s461_s13 = sadd.s32 4294967295, %s525_s12   ;;  %p465_p0 = scmp.ge.s32.totalorder %s525_s12, 1  ;;  %s525_s12 = sphi %s548_s12, %s13_s12  }
   0x2   : > { %p157_p1 = scmp.lt.s32.totalorder %s525_s12, 5 }
   0x4   : > { %p158_p2 = pnand %p465_p0, %p157_p1 }
   0x5   : > { %p191_p3 = scmp.lt.s32.totalorder (!%p158_p2), %s461_s13, 3 }
   0x6   : > { %161 = sbr.rel (%p158_p2) target bundleno = 571 (0x23b), region = 32 }
   0xb   : > { %s605_s13 = smov (!%p191_p3, %s461_s13), 3  ;;  %vm234_vm0 = vcmask 130048   ;;  %vm269_vm1 = vcmask 186368   ;;  %vm262_vm2 = vcmask 187392   ;;  %vm353_vm3 = vcmask 1042432  }
   0xc   : > { %s489_s14 = sshll.u32 %s605_s13, 3  ;;  %s496_s15 = smul.u32 12, %s605_s13  ;;  %vm354_vm4 = vcmask 1043456   ;;  %v527_v33 = vmov 65535  }
   0xd   : > { %s200_s18 = scalar_lea.vmem %s601_s1, %s489_s14  ;;  %v355_v34 = vsel %vm353_vm3, 4294967295, %v527_v33  ;;  %s497_s25 = smul.u32 24, %s605_s13  ;;  %vm380_vm3 = vcmask 129024  }
   0xe   : > { %v491_v0 = vld [vmem:[%s200_s18] sm:$0xff]  ;;  %s195_s21 = scalar_lea.vmem %s600_s0, %s496_s15  ;;  %s205_s24 = scalar_lea.vmem %s602_s2, %s496_s15  ;;  %v356_v35 = vsel %vm354_vm4, %v355_v34, 0 }
   0xf   : > { %v490_v1 = vld [vmem:[%s195_s21] sm:$0xff]  ;;  %v214_v2 = vld [vmem:[%s195_s21 + $0x8] sm:$0xf]  ;;  %248 = vmatpush.bf16.msra.mxu0 %v491_v0  ;;  %493 = vmatpush.bf16.msra.mxu3 %v491_v0  ;;  %s210_s28 = scalar_lea.vmem %s603_s3, %s497_s25 }
  0x10   : > { %v225_v3 = vunpack.c.l.b16 %v214_v2  ;;  %v219_v30 = vld [vmem:[%s205_s24 + $0x8] sm:$0xf]  ;;  %v492_v37 = vld [vmem:[%s205_s24] sm:$0xff] }
  0x11   : > { %v343_v31 = vunpack.c.l.b16 %v219_v30 }
  0x12   : > { %v227_v4 = vpack.c.b16 %v225_v3, %v225_v3  ;;  %479 = vmatmul.msk.bf16.vlgmr.msra.gmra.mxu0 %vm234_vm0, %v490_v1 }
  0x13   : > { %v345_v32 = vpack.c.b16 %v343_v31, %v343_v31 }
  0x14   : > { %480 = vmatmul.msk.bf16.vlgmr.msra.gmra.mxu3 %vm234_vm0, %v227_v4 }
  0x15   : > { %v358_v36 = vand.u32 %v356_v35, %v345_v32 }
  0x17   : > { %494 = vmatpush.bf16.msra.mxu2 %v358_v36  ;;  %366 = vmatpush.bf16.msra.mxu1 %v358_v36 }
  0x1b   : > { %495 = vmatpush.bf16.msra.mxu2 %v492_v37  ;;  %367 = vmatpush.bf16.msra.mxu1 %v492_v37 }
  0x8f   : > { %v250_v5 = vpop.f32.mrf.mxu0 }
  0x90   : > { %v259_v12 = vmul.f32 0.25, %v250_v5 }
  0x92   : > { %v263_v14 = vsel %vm262_vm2, %v259_v12, -inf }
  0x97   : > { %v255_v6 = vpop.f32.mrf.mxu3  ;;  %v252_v8 = vpop.f32.mrf.mxu0 }
  0x98   : > { %v261_v7 = vmul.f32 0.25, %v255_v6  ;;  %v260_v9 = vmul.f32 0.25, %v252_v8 }
  0x9a   : > { %v270_v10 = vsel %vm269_vm1, %v261_v7, -inf  ;;  %v266_v11 = vsel %vm262_vm2, %v260_v9, -inf }
  0x9b   : > { %271 = vmax.xlane.f32.xlu0 %v270_v10  ;;  %267 = vmax.xlane.f32.xlu1 %v266_v11 }
  0x9f   : > { %v257_v13 = vpop.f32.mrf.mxu3 }
  0xa3   : > { %264 = vmax.xlane.f32.xlu0 %v263_v14 }
 0x10e   : > { %v272_v15 = vpop.xlane.xlu0 %271  ;;  %v268_v18 = vpop.xlane.xlu1 %267 }
 0x10f   : > { %v275_v16 = vsub.f32 %v261_v7, %v272_v15  ;;  %v274_v22 = vsub.f32 %v260_v9, %v268_v18 }
 0x111   : > { %v280_v17 = vmul.f32 1.442695, %v275_v16  ;;  %v278_v25 = vmul.f32 1.442695, %v274_v22 }
 0x113   : > { %507 = vpow2.f32 %v280_v17 }
 0x116   : > { %v265_v19 = vpop.xlane.xlu0 %264 }
 0x117   : > { %v273_v20 = vsub.f32 %v259_v12, %v265_v19 }
 0x119   : > { %v508_v21 = vpop.eup %507  ;;  %v276_v23 = vmul.f32 1.442695, %v273_v20 }
 0x11a   : > { %v288_v24 = vsel %vm269_vm1, %v508_v21, 0.0 }
 0x11b   : > { %509 = vpow2.f32 %v276_v23  ;;  %289 = vadd.xlane.f32.xlu1 %v288_v24 }
 0x11c   : > { %511 = vpow2.f32 %v278_v25 }
 0x121   : > { %v574_v26 = vpop.eup %509 }
 0x122   : > { %v282_v27 = vsel %vm262_vm2, %v574_v26, 0.0  ;;  %v578_v28 = vpop.eup %511 }
 0x123   : > { %283 = vadd.xlane.f32.xlu2 %v282_v27  ;;  %v285_v29 = vsel %vm262_vm2, %v578_v28, 0.0 }
 0x12b   : > { %286 = vadd.xlane.f32.xlu2 %v285_v29 }
 0x18e   : > { %v290_v38 = vpop.xlane.xlu1 %289 }
 0x18f   : > { %513 = vrcp.f32 %v290_v38  ;;  %v332_v44 = vand.u32 2147483648, %v290_v38  ;;  %v330_v45 = vand.u32 2147483647, %v290_v38  ;;  %vm326_vm6 = vweird.f32 %v290_v38 }
 0x191   : > { %v333_v48 = vor.u32 1.1754944e-38, %v332_v44  ;;  %vm331_vm8 = vcmp.eq.f32.partialorder %v330_v45, 8.507059e+37 }
 0x195   : > { %v514_v39 = vpop.eup %513 }
 0x196   : > { %v322_v40 = vmul.f32 %v514_v39, %v290_v38  ;;  %v284_v41 = vpop.xlane.xlu2 %283  ;;  %vm327_vm5 = vweird.f32 %v514_v39 }
 0x197   : > { %515 = vrcp.f32 %v284_v41  ;;  %vm328_vm7 = vmor %vm326_vm6, %vm327_vm5  ;;  %v302_v60 = vand.u32 2147483648, %v284_v41  ;;  %vm296_vm10 = vweird.f32 %v284_v41  ;;  %v300_v61 = vand.u32 2147483647, %v284_v41 }
 0x198   : > { %v323_v42 = vsub.f32 1.0, %v322_v40 }
 0x199   : > { %v303_v3 = vor.u32 1.1754944e-38, %v302_v60  ;;  %vm301_vm13 = vcmp.eq.f32.partialorder %v300_v61, 8.507059e+37 }
 0x19a   : > { %v324_v43 = vmul.f32 %v514_v39, %v323_v42 }
 0x19c   : > { %v325_v46 = vadd.f32 %v514_v39, %v324_v43 }
 0x19d   : > { %v516_v47 = vpop.eup %515 }
 0x19e   : > { %v292_v49 = vmul.f32 %v516_v47, %v284_v41  ;;  %v287_v50 = vpop.xlane.xlu2 %286  ;;  %v329_v51 = vsel %vm328_vm7, %v514_v39, %v325_v46  ;;  %vm297_vm9 = vweird.f32 %v516_v47 }
 0x19f   : > { %517 = vrcp.f32 %v287_v50  ;;  %v334_v53 = vsel %vm331_vm8, %v333_v48, %v329_v51  ;;  %vm298_vm11 = vmor %vm296_vm10, %vm297_vm9  ;;  %v317_v63 = vand.u32 2147483648, %v287_v50  ;;  %v315_v1 = vand.u32 2147483647, %v287_v50 }
 0x1a0   : > { %v293_v52 = vsub.f32 1.0, %v292_v49  ;;  %v335_v54 = vmul.f32 %v508_v21, %v334_v53  ;;  %vm311_vm14 = vweird.f32 %v287_v50 }
 0x1a1   : > { %v318_v5 = vor.u32 1.1754944e-38, %v317_v63  ;;  %vm316_vm1 = vcmp.eq.f32.partialorder %v315_v1, 8.507059e+37 }
 0x1a2   : > { %v294_v55 = vmul.f32 %v516_v47, %v293_v52  ;;  %v337_v56 = vpack.c.bf16 %v335_v54, %v335_v54 }
 0x1a4   : > { %486 = vmatmul.msk.bf16.vlgmr.msra.gmra.mxu2 %vm262_vm2, %v337_v56  ;;  %v295_v58 = vadd.f32 %v516_v47, %v294_v55 }
 0x1a5   : > { %v518_v57 = vpop.eup %517 }
 0x1a6   : > { %v307_v59 = vmul.f32 %v518_v57, %v287_v50  ;;  %vm312_vm12 = vweird.f32 %v518_v57  ;;  %v299_v2 = vsel %vm298_vm11, %v516_v47, %v295_v58 }
 0x1a7   : > { %vm313_vm15 = vmor %vm311_vm14, %vm312_vm12  ;;  %v304_v6 = vsel %vm301_vm13, %v303_v3, %v299_v2 }
 0x1a8   : > { %v308_v62 = vsub.f32 1.0, %v307_v59  ;;  %v305_v9 = vmul.f32 %v574_v26, %v304_v6 }
 0x1aa   : > { %v309_v0 = vmul.f32 %v518_v57, %v308_v62 }
 0x1ac   : > { %v310_v4 = vadd.f32 %v518_v57, %v309_v0 }
 0x1ae   : > { %v314_v7 = vsel %vm313_vm15, %v518_v57, %v310_v4 }
 0x1af   : > { %v319_v8 = vsel %vm316_vm1, %v318_v5, %v314_v7 }
 0x1b0   : > { %v320_v10 = vmul.f32 %v578_v28, %v319_v8 }
 0x1b2   : > { %v336_v11 = vpack.c.bf16 %v320_v10, %v305_v9 }
 0x1b4   : > { %485 = vmatmul.msk.bf16.vlgmr.msra.gmra.mxu1 %vm262_vm2, %v336_v11 }
 0x227   : > { %v374_v12 = vpop.f32.mrf.mxu2 }
 0x228   : > { %381 = vst.msk [vmem:[%s210_s28 + $0x10] sm:$0x7f] %vm380_vm3, %v374_v12 }
 0x22f   : > { %v376_v13 = vpop.f32.mrf.mxu2 }
 0x231   : > { %v369_v14 = vpop.f32.mrf.mxu1 }
 0x232   : > { %378 = vst.msk [vmem:[%s210_s28] sm:$0xff] %vm234_vm0, %v369_v14 }
 0x239   : > { %v371_v15 = vpop.f32.mrf.mxu1 }
 0x23a   : > { %379 = vst.msk [vmem:[%s210_s28 + $0x8] sm:$0xff] %vm234_vm0, %v371_v15 }
 0x23b PF: > { %s13_s12 = sadd.s32 1, %s525_s12  }
 0x23c   : > { %p10_p4 = scmp.ge.s32.totalorder %s13_s12, 6  }
 0x23e   :  { %12 = sbr.rel (!%p10_p4) target bundleno = 1 (0x1), region = 68 }

// kernel: _lambda_.29
= control target key start
LH: loop header
LB: loop body
LE: loop exit
PB: predicated region body
PF: predicated region fallthrough
CT: control target
= control target key end

     0   :  { %vm27_vm0 = vcmask 261120   ;;  %v354_v12 = vmov 32.0   ;;  %s509_s0 = inlined_call_operand.vmem [shape: f32[48,32], index: 0, kind: input, shape index: {}]   ;;  %s510_s1 = inlined_call_operand.vmem [shape: f32[1,32], index: 1, kind: input, shape index: {}]   ;;  %s511_s2 = inlined_call_operand.vmem [shape: f32[1,32], index: 2, kind: input, shape index: {}]   ;;  %s512_s4 = inlined_call_operand.vmem [shape: f32[1,128], index: 4, kind: input, shape index: {}]   ;;  %s513_s3 = inlined_call_operand.vmem [shape: bf16[32,128], index: 3, kind: input, shape index: {}]   ;;  %s514_s5 = inlined_call_operand.vmem [shape: f32[48,128], index: 5, kind: output, shape index: {}]  }
   0x1   :  { %v25_v0 = vld [vmem:[%s509_s0 + $0x20] sm:$0xff]  ;;  %v23_v1 = vld [vmem:[%s509_s0 + $0x10] sm:$0xff]  ;;  %v26_v6 = vld [vmem:[%s509_s0 + $0x28] sm:$0xff]  ;;  %328 = vrcp.f32 %v354_v12 }
   0x2   :  { %v21_v2 = vld [vmem:[%s509_s0] sm:$0xff]  ;;  %v40_v3 = vsel %vm27_vm0, %v25_v0, 0.0  ;;  %v34_v4 = vsel %vm27_vm0, %v23_v1, 0.0  ;;  %v24_v7 = vld [vmem:[%s509_s0 + $0x18] sm:$0xff]  ;;  %v22_v8 = vld [vmem:[%s509_s0 + $0x8] sm:$0xff]  ;;  %v43_v9 = vsel %vm27_vm0, %v26_v6, 0.0 }
   0x3   :  { %v28_v5 = vsel %vm27_vm0, %v21_v2, 0.0  ;;  %41 = vadd.xlane.f32.xlu0 %v40_v3  ;;  %35 = vadd.xlane.f32.xlu2 %v34_v4  ;;  %v37_v10 = vsel %vm27_vm0, %v24_v7, 0.0  ;;  %v31_v11 = vsel %vm27_vm0, %v22_v8, 0.0  ;;  %v319_v50 = vld [vmem:[%s513_s3 + $0x8] sm:$0xff]  ;;  %v318_v56 = vld [vmem:[%s513_s3] sm:$0xff] }
   0x4   :  { %29 = vadd.xlane.f32.xlu1 %v28_v5  ;;  %225 = vmatpush.bf16.msra.mxu0 %v319_v50 }
   0x5   :  { %321 = vmatpush.bf16.msra.mxu2 %v319_v50  ;;  %320 = vmatpush.bf16.msra.mxu1 %v319_v50 }
   0x7   :  { %v329_v13 = vpop.eup %328 }
   0x8   :  { %v47_v14 = vmul.f32 32.0, %v329_v13  ;;  %vm51_vm1 = vweird.f32 %v329_v13  ;;  %226 = vmatpush.bf16.msra.mxu0 %v318_v56 }
   0x9   :  { %323 = vmatpush.bf16.msra.mxu2 %v318_v56  ;;  %322 = vmatpush.bf16.msra.mxu1 %v318_v56 }
   0xa   :  { %v48_v15 = vsub.f32 1.0, %v47_v14 }
   0xb   :  { %44 = vadd.xlane.f32.xlu0 %v43_v9  ;;  %38 = vadd.xlane.f32.xlu2 %v37_v10 }
   0xc   :  { %32 = vadd.xlane.f32.xlu1 %v31_v11  ;;  %v49_v16 = vmul.f32 %v329_v13, %v48_v15 }
   0xe   :  { %v50_v17 = vadd.f32 %v329_v13, %v49_v16 }
  0x10   :  { %v409_v18 = vsel %vm51_vm1, %v329_v13, %v50_v17 }
  0x76   :  { %v42_v19 = vpop.xlane.xlu0 %41  ;;  %v36_v20 = vpop.xlane.xlu2 %35 }
  0x77   :  { %v57_v21 = vmul.f32 %v409_v18, %v42_v19  ;;  %v30_v22 = vpop.xlane.xlu1 %29  ;;  %v55_v36 = vmul.f32 %v409_v18, %v36_v20 }
  0x78   :  { %v53_v23 = vmul.f32 %v409_v18, %v30_v22 }
  0x79   :  { %v413_v24 = vsub.f32 %v25_v0, %v57_v21  ;;  %v439_v43 = vsub.f32 %v23_v1, %v55_v36 }
  0x7a   :  { %v415_v25 = vsub.f32 %v21_v2, %v53_v23 }
  0x7b   :  { %v69_v26 = vmul.f32 %v413_v24, %v413_v24  ;;  %v67_v47 = vmul.f32 %v439_v43, %v439_v43 }
  0x7c   :  { %v65_v27 = vmul.f32 %v415_v25, %v415_v25 }
  0x7d   :  { %v83_v28 = vsel %vm27_vm0, %v69_v26, 0.0  ;;  %v77_v48 = vsel %vm27_vm0, %v67_v47, 0.0 }
  0x7e   :  { %84 = vadd.xlane.f32.xlu0 %v83_v28  ;;  %v45_v29 = vpop.xlane.xlu0 %44  ;;  %v39_v30 = vpop.xlane.xlu2 %38  ;;  %v71_v31 = vsel %vm27_vm0, %v65_v27, 0.0 }
  0x7f   :  { %v58_v32 = vmul.f32 %v409_v18, %v45_v29  ;;  %v56_v33 = vmul.f32 %v409_v18, %v39_v30  ;;  %72 = vadd.xlane.f32.xlu2 %v71_v31  ;;  %v33_v34 = vpop.xlane.xlu1 %32 }
  0x80   :  { %v54_v35 = vmul.f32 %v409_v18, %v33_v34 }
  0x81   :  { %v427_v37 = vsub.f32 %v26_v6, %v58_v32  ;;  %v429_v38 = vsub.f32 %v24_v7, %v56_v33 }
  0x82   :  { %v431_v39 = vsub.f32 %v22_v8, %v54_v35 }
  0x83   :  { %v70_v40 = vmul.f32 %v427_v37, %v427_v37  ;;  %v68_v41 = vmul.f32 %v429_v38, %v429_v38 }
  0x84   :  { %v66_v42 = vmul.f32 %v431_v39, %v431_v39 }
  0x85   :  { %v86_v44 = vsel %vm27_vm0, %v70_v40, 0.0  ;;  %v80_v45 = vsel %vm27_vm0, %v68_v41, 0.0  ;;  %v325_v41 = vld [vmem:[%s510_s1] ss:$0 sm:$0xff] }
  0x86   :  { %87 = vadd.xlane.f32.xlu1 %v86_v44  ;;  %v74_v46 = vsel %vm27_vm0, %v66_v42, 0.0 }
  0x87   :  { %81 = vadd.xlane.f32.xlu2 %v80_v45  ;;  %75 = vadd.xlane.f32.xlu0 %v74_v46 }
  0x8e   :  { %78 = vadd.xlane.f32.xlu1 %v77_v48 }
  0xf1   :  { %v85_v49 = vpop.xlane.xlu0 %84 }
  0xf2   :  { %v93_v51 = vmul.f32 %v85_v49, %v409_v18  ;;  %v73_v52 = vpop.xlane.xlu2 %72 }
  0xf3   :  { %v89_v53 = vmul.f32 %v73_v52, %v409_v18  ;;  %v326_v52 = vld [vmem:[%s511_s2] ss:$0 sm:$0xff] }
  0xf4   :  { %v99_v54 = vadd.f32 1e-06, %v93_v51 }
  0xf5   :  { %v95_v55 = vadd.f32 1e-06, %v89_v53 }
  0xf6   :  { %330 = vrsqrt.f32 %v99_v54  ;;  %vm147_vm3 = vweird.f32 %v99_v54 }
  0xf7   :  { %332 = vrsqrt.f32 %v95_v55  ;;  %vm107_vm4 = vweird.f32 %v95_v55 }
  0xf9   :  { %v88_v57 = vpop.xlane.xlu1 %87 }
  0xfa   :  { %v82_v58 = vpop.xlane.xlu2 %81  ;;  %v76_v59 = vpop.xlane.xlu0 %75  ;;  %v94_v60 = vmul.f32 %v88_v57, %v409_v18 }
  0xfb   :  { %v92_v61 = vmul.f32 %v82_v58, %v409_v18  ;;  %v90_v62 = vmul.f32 %v76_v59, %v409_v18 }
  0xfc   :  { %v331_v63 = vpop.eup %330  ;;  %v100_v0 = vadd.f32 1e-06, %v94_v60 }
  0xfd   :  { %v333_v1 = vpop.eup %332  ;;  %v142_v2 = vmul.f32 %v331_v63, %v99_v54  ;;  %v98_v3 = vadd.f32 1e-06, %v92_v61  ;;  %v96_v4 = vadd.f32 1e-06, %v90_v62  ;;  %vm148_vm2 = vweird.f32 %v331_v63 }
  0xfe   :  { %v102_v5 = vmul.f32 %v333_v1, %v95_v55  ;;  %334 = vrsqrt.f32 %v100_v0  ;;  %vm108_vm5 = vweird.f32 %v333_v1  ;;  %vm149_vm6 = vmor %vm147_vm3, %vm148_vm2  ;;  %vm157_vm9 = vweird.f32 %v100_v0 }
  0xff   :  { %v143_v6 = vmul.f32 %v331_v63, %v142_v2  ;;  %336 = vrsqrt.f32 %v98_v3  ;;  %vm459_vm7 = vmor %vm107_vm4, %vm108_vm5  ;;  %vm137_vm8 = vweird.f32 %v98_v3  ;;  %vm117_vm12 = vweird.f32 %v96_v4 }
 0x100   :  { %v103_v7 = vmul.f32 %v333_v1, %v102_v5  ;;  %338 = vrsqrt.f32 %v96_v4 }
 0x101   :  { %v144_v8 = vmul.f32 0.5, %v143_v6  ;;  %v79_v9 = vpop.xlane.xlu1 %78 }
 0x102   :  { %v104_v10 = vmul.f32 0.5, %v103_v7  ;;  %v91_v11 = vmul.f32 %v79_v9, %v409_v18  ;;  %v327_v9 = vld [vmem:[%s512_s4] ss:$0 sm:$0xff] }
 0x103   :  { %v145_v12 = vsub.f32 1.5, %v144_v8 }
 0x104   :  { %v335_v13 = vpop.eup %334  ;;  %v105_v14 = vsub.f32 1.5, %v104_v10  ;;  %v97_v15 = vadd.f32 1e-06, %v91_v11 }
 0x105   :  { %v337_v16 = vpop.eup %336  ;;  %v146_v17 = vmul.f32 %v331_v63, %v145_v12  ;;  %v152_v19 = vmul.f32 %v335_v13, %v100_v0  ;;  %vm158_vm10 = vweird.f32 %v335_v13 }
 0x106   :  { %v339_v20 = vpop.eup %338  ;;  %v132_v21 = vmul.f32 %v337_v16, %v98_v3  ;;  %340 = vrsqrt.f32 %v97_v15  ;;  %v106_v22 = vmul.f32 %v333_v1, %v105_v14  ;;  %vm138_vm11 = vweird.f32 %v337_v16  ;;  %vm159_vm14 = vmor %vm157_vm9, %vm158_vm10 }
 0x107   :  { %v112_v23 = vmul.f32 %v339_v20, %v96_v4  ;;  %v153_v26 = vmul.f32 %v335_v13, %v152_v19  ;;  %v150_v18 = vsel %vm149_vm6, %v331_v63, %v146_v17  ;;  %vm118_vm13 = vweird.f32 %v339_v20  ;;  %vm472_vm15 = vmor %vm137_vm8, %vm138_vm11 }
 0x108   :  { %v133_v27 = vmul.f32 %v337_v16, %v132_v21  ;;  %v110_v32 = vsel %vm459_vm7, %v333_v1, %v106_v22  ;;  %v165_v36 = vmul.f32 %v150_v18, %v413_v24  ;;  %vm119_vm1 = vmor %vm117_vm12, %vm118_vm13  ;;  %vm127_vm3 = vweird.f32 %v97_v15 }
 0x109   :  { %v113_v28 = vmul.f32 %v339_v20, %v112_v23  ;;  %v154_v29 = vmul.f32 0.5, %v153_v26  ;;  %v161_v46 = vmul.f32 %v110_v32, %v415_v25 }
 0x10a   :  { %v134_v31 = vmul.f32 0.5, %v133_v27  ;;  %v175_v53 = vmul.f32 %v325_v41, %v165_v36 }
 0x10b   :  { %v114_v33 = vmul.f32 0.5, %v113_v28  ;;  %v155_v34 = vsub.f32 1.5, %v154_v29  ;;  %v171_v57 = vmul.f32 %v325_v41, %v161_v46 }
 0x10c   :  { %v341_v35 = vpop.eup %340  ;;  %v135_v40 = vsub.f32 1.5, %v134_v31 }
 0x10d   :  { %v115_v42 = vsub.f32 1.5, %v114_v33  ;;  %v156_v44 = vmul.f32 %v335_v13, %v155_v34  ;;  %v122_v45 = vmul.f32 %v341_v35, %v97_v15  ;;  %vm128_vm2 = vweird.f32 %v341_v35 }
 0x10e   :  { %v136_v47 = vmul.f32 %v337_v16, %v135_v40  ;;  %vm129_vm4 = vmor %vm127_vm3, %vm128_vm2  ;;  %v181_v0 = vadd.f32 %v326_v52, %v171_v57 }
 0x10f   :  { %v116_v24 = vmul.f32 %v339_v20, %v115_v42  ;;  %v160_v49 = vsel %vm159_vm14, %v335_v13, %v156_v44  ;;  %v123_v50 = vmul.f32 %v341_v35, %v122_v45 }
 0x110   :  { %v166_v51 = vmul.f32 %v160_v49, %v427_v37  ;;  %v140_v25 = vsel %vm472_vm15, %v337_v16, %v136_v47  ;;  %v185_v37 = vadd.f32 %v326_v52, %v175_v53 }
 0x111   :  { %v120_v54 = vsel %vm119_vm1, %v339_v20, %v116_v24  ;;  %v124_v55 = vmul.f32 0.5, %v123_v50  ;;  %v164_v60 = vmul.f32 %v140_v25, %v429_v38 }
 0x112   :  { %v162_v56 = vmul.f32 %v120_v54, %v431_v39  ;;  %v176_v58 = vmul.f32 %v325_v41, %v166_v51 }
 0x113   :  { %v125_v59 = vsub.f32 1.5, %v124_v55  ;;  %v174_v39 = vmul.f32 %v325_v41, %v164_v60 }
 0x114   :  { %v172_v61 = vmul.f32 %v325_v41, %v162_v56  ;;  %v186_v62 = vadd.f32 %v326_v52, %v176_v58 }
 0x115   :  { %v126_v63 = vmul.f32 %v341_v35, %v125_v59  ;;  %v184_v7 = vadd.f32 %v326_v52, %v174_v39 }
 0x116   :  { %v182_v1 = vadd.f32 %v326_v52, %v172_v61  ;;  %v189_v2 = vpack.c.bf16 %v186_v62, %v185_v37 }
 0x117   :  { %v130_v3 = vsel %vm129_vm4, %v341_v35, %v126_v63 }
 0x118   :  { %v163_v4 = vmul.f32 %v130_v3, %v439_v43  ;;  %v187_v5 = vpack.c.bf16 %v182_v1, %v181_v0  ;;  %317 = vmatmul.msk.bf16.vlgmr.msra.gmra.mxu2 %vm27_vm0, %v189_v2 }
 0x11a   :  { %315 = vmatmul.msk.bf16.vlgmr.msra.gmra.mxu0 %vm27_vm0, %v187_v5  ;;  %v173_v6 = vmul.f32 %v325_v41, %v163_v4 }
 0x11c   :  { %v183_v38 = vadd.f32 %v326_v52, %v173_v6 }
 0x11e   :  { %v188_v8 = vpack.c.bf16 %v184_v7, %v183_v38 }
 0x120   :  { %316 = vmatmul.msk.bf16.vlgmr.msra.gmra.mxu1 %vm27_vm0, %v188_v8 }
 0x197   :  { %v228_v10 = vpop.f32.mrf.mxu0 }
 0x198   :  { %v229_v11 = vadd.f32 %v327_v9, %v228_v10 }
 0x19a   :  { %v249_v12 = vmul.f32 0.044715, %v229_v11  ;;  %v243_v51 = vmul.f32 0.5, %v229_v11 }
 0x19b   :  { %v238_v43 = vpop.f32.mrf.mxu2 }
 0x19c   :  { %v255_v13 = vmul.f32 %v249_v12, %v229_v11  ;;  %v239_v14 = vadd.f32 %v327_v9, %v238_v43 }
 0x19d   :  { %v233_v15 = vpop.f32.mrf.mxu1 }
 0x19e   :  { %v261_v16 = vmul.f32 %v255_v13, %v229_v11  ;;  %v253_v17 = vmul.f32 0.044715, %v239_v14  ;;  %v234_v19 = vadd.f32 %v327_v9, %v233_v15  ;;  %v247_v58 = vmul.f32 0.5, %v239_v14 }
 0x19f   :  { %v230_v20 = vpop.f32.mrf.mxu0 }
 0x1a0   :  { %v267_v21 = vadd.f32 %v261_v16, %v229_v11  ;;  %v259_v22 = vmul.f32 %v253_v17, %v239_v14  ;;  %v231_v23 = vadd.f32 %v327_v9, %v230_v20  ;;  %v251_v26 = vmul.f32 0.044715, %v234_v19 }
 0x1a1   :  { %v245_v0 = vmul.f32 0.5, %v234_v19 }
 0x1a2   :  { %v273_v27 = vmul.f32 0.7978846, %v267_v21  ;;  %v265_v18 = vmul.f32 %v259_v22, %v239_v14  ;;  %v250_v28 = vmul.f32 0.044715, %v231_v23  ;;  %v257_v29 = vmul.f32 %v251_v26, %v234_v19 }
 0x1a3   :  { %v240_v30 = vpop.f32.mrf.mxu2  ;;  %v244_v2 = vmul.f32 0.5, %v231_v23 }
 0x1a4   :  { %342 = vtanh.f32 %v273_v27  ;;  %v271_v31 = vadd.f32 %v265_v18, %v239_v14  ;;  %v256_v32 = vmul.f32 %v250_v28, %v231_v23  ;;  %v241_v33 = vadd.f32 %v327_v9, %v240_v30 }
 0x1a5   :  { %v263_v34 = vmul.f32 %v257_v29, %v234_v19  ;;  %v235_v35 = vpop.f32.mrf.mxu1 }
 0x1a6   :  { %v277_v36 = vmul.f32 0.7978846, %v271_v31  ;;  %v262_v40 = vmul.f32 %v256_v32, %v231_v23  ;;  %v254_v41 = vmul.f32 0.044715, %v241_v33  ;;  %v236_v44 = vadd.f32 %v327_v9, %v235_v35 }
 0x1a7   :  { %v269_v42 = vadd.f32 %v263_v34, %v234_v19  ;;  %v248_v6 = vmul.f32 0.5, %v241_v33 }
 0x1a8   :  { %344 = vtanh.f32 %v277_v36  ;;  %v268_v45 = vadd.f32 %v262_v40, %v231_v23  ;;  %v260_v46 = vmul.f32 %v254_v41, %v241_v33  ;;  %v252_v48 = vmul.f32 0.044715, %v236_v44 }
 0x1a9   :  { %v275_v47 = vmul.f32 0.7978846, %v269_v42  ;;  %v246_v9 = vmul.f32 0.5, %v236_v44 }
 0x1aa   :  { %v343_v24 = vpop.eup %342  ;;  %v274_v49 = vmul.f32 0.7978846, %v268_v45  ;;  %v266_v50 = vmul.f32 %v260_v46, %v241_v33  ;;  %v258_v53 = vmul.f32 %v252_v48, %v236_v44 }
 0x1ab   :  { %v285_v52 = vadd.f32 1.0, %v343_v24  ;;  %346 = vtanh.f32 %v275_v47 }
 0x1ac   :  { %348 = vtanh.f32 %v274_v49  ;;  %v272_v25 = vadd.f32 %v266_v50, %v241_v33  ;;  %v264_v55 = vmul.f32 %v258_v53, %v236_v44 }
 0x1ad   :  { %v291_v54 = vmul.f32 %v285_v52, %v243_v51 }
 0x1ae   :  { %v345_v56 = vpop.eup %344  ;;  %v278_v57 = vmul.f32 0.7978846, %v272_v25  ;;  %v270_v60 = vadd.f32 %v264_v55, %v236_v44 }
 0x1af   :  { %297 = vst [vmem:[%s514_s5] sm:$0xff] %v291_v54  ;;  %v289_v59 = vadd.f32 1.0, %v345_v56 }
 0x1b0   :  { %350 = vtanh.f32 %v278_v57  ;;  %v276_v62 = vmul.f32 0.7978846, %v270_v60 }
 0x1b1   :  { %v347_v61 = vpop.eup %346  ;;  %v295_v37 = vmul.f32 %v289_v59, %v247_v58 }
 0x1b2   :  { %v349_v63 = vpop.eup %348  ;;  %v287_v1 = vadd.f32 1.0, %v347_v61  ;;  %352 = vtanh.f32 %v276_v62 }
 0x1b3   :  { %301 = vst [vmem:[%s514_s5 + $0x20] sm:$0xff] %v295_v37  ;;  %v286_v3 = vadd.f32 1.0, %v349_v63 }
 0x1b4   :  { %v293_v4 = vmul.f32 %v287_v1, %v245_v0 }
 0x1b5   :  { %v292_v5 = vmul.f32 %v286_v3, %v244_v2 }
 0x1b6   :  { %v351_v39 = vpop.eup %350  ;;  %299 = vst [vmem:[%s514_s5 + $0x10] sm:$0xff] %v293_v4 }
 0x1b7   :  { %298 = vst [vmem:[%s514_s5 + $0x8] sm:$0xff] %v292_v5  ;;  %v290_v38 = vadd.f32 1.0, %v351_v39 }
 0x1b8   :  { %v353_v7 = vpop.eup %352 }
 0x1b9   :  { %v296_v8 = vmul.f32 %v290_v38, %v248_v6  ;;  %v288_v10 = vadd.f32 1.0, %v353_v7 }
 0x1bb   :  { %302 = vst [vmem:[%s514_s5 + $0x28] sm:$0xff] %v296_v8  ;;  %v294_v11 = vmul.f32 %v288_v10, %v246_v9 }
 0x1bd   :  { %300 = vst [vmem:[%s514_s5 + $0x18] sm:$0xff] %v294_v11 }

// kernel: _lambda_.30
= control target key start
LH: loop header
LB: loop body
LE: loop exit
PB: predicated region body
PF: predicated region fallthrough
CT: control target
= control target key end

     0   :  { %s265_s1 = inlined_call_operand.vmem [shape: bf16[128,128], index: 1, kind: input, shape index: {}]   ;;  %s266_s2 = inlined_call_operand.vmem [shape: f32[1,128], index: 2, kind: input, shape index: {}]   ;;  %s267_s0 = inlined_call_operand.vmem [shape: f32[48,128], index: 0, kind: input, shape index: {}]   ;;  %s268_s3 = inlined_call_operand.vmem [shape: f32[48,128], index: 3, kind: output, shape index: {}]  }
   0x1   :  { %v164_v0 = vld [vmem:[%s265_s1 + $0x38] sm:$0xff]  ;;  %v163_v1 = vld [vmem:[%s265_s1 + $0x30] sm:$0xff]  ;;  %v162_v2 = vld [vmem:[%s265_s1 + $0x28] sm:$0xff] }
   0x2   :  { %91 = vmatpush.bf16.msra.mxu0 %v164_v0  ;;  %165 = vmatpush.bf16.msra.mxu1 %v164_v0  ;;  %v161_v3 = vld [vmem:[%s265_s1 + $0x20] sm:$0xff]  ;;  %v160_v4 = vld [vmem:[%s265_s1 + $0x18] sm:$0xff]  ;;  %v159_v5 = vld [vmem:[%s265_s1 + $0x10] sm:$0xff] }
   0x3   :  { %166 = vmatpush.bf16.msra.mxu2 %v164_v0  ;;  %v158_v6 = vld [vmem:[%s265_s1 + $0x8] sm:$0xff]  ;;  %v157_v7 = vld [vmem:[%s265_s1] sm:$0xff]  ;;  %v16_v10 = vld [vmem:[%s267_s0 + $0x10] sm:$0xff] }
   0x4   :  { %v14_v8 = vld [vmem:[%s267_s0] sm:$0xff]  ;;  %v15_v9 = vld [vmem:[%s267_s0 + $0x8] sm:$0xff]  ;;  %v17_v11 = vld [vmem:[%s267_s0 + $0x18] sm:$0xff] }
   0x5   :  { %v18_v12 = vld [vmem:[%s267_s0 + $0x20] sm:$0xff]  ;;  %v19_v13 = vld [vmem:[%s267_s0 + $0x28] sm:$0xff]  ;;  %v20_v14 = vpack.c.bf16 %v15_v9, %v14_v8  ;;  %v21_v15 = vpack.c.bf16 %v17_v11, %v16_v10 }
   0x6   :  { %92 = vmatpush.bf16.msra.mxu0 %v163_v1  ;;  %167 = vmatpush.bf16.msra.mxu1 %v163_v1  ;;  %v22_v16 = vpack.c.bf16 %v19_v13, %v18_v12  ;;  %v181_v17 = vld [vmem:[%s266_s2] ss:$0 sm:$0xff] }
   0x7   :  { %168 = vmatpush.bf16.msra.mxu2 %v163_v1 }
   0xa   :  { %93 = vmatpush.bf16.msra.mxu0 %v162_v2  ;;  %169 = vmatpush.bf16.msra.mxu1 %v162_v2 }
   0xb   :  { %170 = vmatpush.bf16.msra.mxu2 %v162_v2 }
   0xe   :  { %94 = vmatpush.bf16.msra.mxu0 %v161_v3  ;;  %171 = vmatpush.bf16.msra.mxu1 %v161_v3 }
   0xf   :  { %172 = vmatpush.bf16.msra.mxu2 %v161_v3 }
  0x12   :  { %95 = vmatpush.bf16.msra.mxu0 %v160_v4  ;;  %173 = vmatpush.bf16.msra.mxu1 %v160_v4 }
  0x13   :  { %174 = vmatpush.bf16.msra.mxu2 %v160_v4 }
  0x16   :  { %96 = vmatpush.bf16.msra.mxu0 %v159_v5  ;;  %175 = vmatpush.bf16.msra.mxu1 %v159_v5 }
  0x17   :  { %176 = vmatpush.bf16.msra.mxu2 %v159_v5 }
  0x1a   :  { %97 = vmatpush.bf16.msra.mxu0 %v158_v6  ;;  %177 = vmatpush.bf16.msra.mxu1 %v158_v6 }
  0x1b   :  { %178 = vmatpush.bf16.msra.mxu2 %v158_v6 }
  0x1e   :  { %98 = vmatpush.bf16.msra.mxu0 %v157_v7  ;;  %179 = vmatpush.bf16.msra.mxu1 %v157_v7 }
  0x1f   :  { %180 = vmatpush.bf16.msra.mxu2 %v157_v7 }
  0x21   :  { %99 = vmatmul.bf16.vlgmr.msra.gmra.mxu0 %v20_v14  ;;  %104 = vmatmul.bf16.vlgmr.msra.gmra.mxu1 %v21_v15 }
  0x22   :  { %109 = vmatmul.bf16.vlgmr.msra.gmra.mxu2 %v22_v16 }
  0x9e   :  { %v100_v18 = vpop.f32.mrf.mxu0  ;;  %v105_v19 = vpop.f32.mrf.mxu1 }
  0x9f   :  { %v101_v20 = vadd.f32 %v181_v17, %v100_v18  ;;  %v106_v21 = vadd.f32 %v181_v17, %v105_v19 }
  0xa1   :  { %115 = vst [vmem:[%s268_s3] sm:$0xff] %v101_v20 }
  0xa2   :  { %117 = vst [vmem:[%s268_s3 + $0x10] sm:$0xff] %v106_v21 }
  0xa5   :  { %v110_v22 = vpop.f32.mrf.mxu2 }
  0xa6   :  { %v111_v23 = vadd.f32 %v181_v17, %v110_v22  ;;  %v102_v24 = vpop.f32.mrf.mxu0  ;;  %v107_v25 = vpop.f32.mrf.mxu1 }
  0xa7   :  { %v103_v26 = vadd.f32 %v181_v17, %v102_v24  ;;  %v108_v27 = vadd.f32 %v181_v17, %v107_v25 }
  0xa8   :  { %119 = vst [vmem:[%s268_s3 + $0x20] sm:$0xff] %v111_v23 }
  0xa9   :  { %116 = vst [vmem:[%s268_s3 + $0x8] sm:$0xff] %v103_v26 }
  0xaa   :  { %118 = vst [vmem:[%s268_s3 + $0x18] sm:$0xff] %v108_v27 }
  0xad   :  { %v112_v28 = vpop.f32.mrf.mxu2 }
  0xae   :  { %v113_v29 = vadd.f32 %v181_v17, %v112_v28 }
  0xb0   :  { %120 = vst [vmem:[%s268_s3 + $0x28] sm:$0xff] %v113_v29 }

// kernel: _lambda_.36
= control target key start
LH: loop header
LB: loop body
LE: loop exit
PB: predicated region body
PF: predicated region fallthrough
CT: control target
= control target key end

     0   :  { %vm15_vm0 = vcmask 261120   ;;  %v67_v2 = vmov 32.0   ;;  %s103_s0 = inlined_call_operand.vmem [shape: f32[8,32], index: 0, kind: input, shape index: {}]   ;;  %s104_s1 = inlined_call_operand.vmem [shape: f32[1,32], index: 1, kind: input, shape index: {}]   ;;  %s105_s2 = inlined_call_operand.vmem [shape: f32[1,32], index: 2, kind: input, shape index: {}]   ;;  %s106_s3 = inlined_call_operand.vmem [shape: f32[8,32], index: 3, kind: output, shape index: {}]  }
   0x1   :  { %v14_v0 = vld [vmem:[%s103_s0] sm:$0xff]  ;;  %63 = vrcp.f32 %v67_v2 }
   0x2   :  { %v16_v1 = vsel %vm15_vm0, %v14_v0, 0.0  ;;  %v61_v23 = vld [vmem:[%s104_s1] ss:$0 sm:$0xff] }
   0x3   :  { %17 = vadd.xlane.f32.xlu0 %v16_v1  ;;  %v62_v25 = vld [vmem:[%s105_s2] ss:$0 sm:$0xff] }
   0x7   :  { %v64_v3 = vpop.eup %63 }
   0x8   :  { %v20_v4 = vmul.f32 32.0, %v64_v3  ;;  %vm24_vm1 = vweird.f32 %v64_v3 }
   0xa   :  { %v21_v5 = vsub.f32 1.0, %v20_v4 }
   0xc   :  { %v22_v6 = vmul.f32 %v64_v3, %v21_v5 }
   0xe   :  { %v23_v7 = vadd.f32 %v64_v3, %v22_v6 }
  0x10   :  { %v25_v8 = vsel %vm24_vm1, %v64_v3, %v23_v7 }
  0x76   :  { %v18_v9 = vpop.xlane.xlu0 %17 }
  0x77   :  { %v26_v10 = vmul.f32 %v25_v8, %v18_v9 }
  0x79   :  { %v27_v11 = vsub.f32 %v14_v0, %v26_v10 }
  0x7b   :  { %v28_v12 = vmul.f32 %v27_v11, %v27_v11 }
  0x7d   :  { %v29_v13 = vsel %vm15_vm0, %v28_v12, 0.0 }
  0x7e   :  { %30 = vadd.xlane.f32.xlu0 %v29_v13 }
  0xf1   :  { %v31_v14 = vpop.xlane.xlu0 %30 }
  0xf2   :  { %v32_v15 = vmul.f32 %v31_v14, %v25_v8 }
  0xf4   :  { %v33_v16 = vadd.f32 1e-06, %v32_v15 }
  0xf6   :  { %65 = vrsqrt.f32 %v33_v16  ;;  %vm40_vm3 = vweird.f32 %v33_v16 }
  0xfc   :  { %v66_v17 = vpop.eup %65 }
  0xfd   :  { %v35_v18 = vmul.f32 %v66_v17, %v33_v16  ;;  %vm41_vm2 = vweird.f32 %v66_v17 }
  0xfe   :  { %vm42_vm4 = vmor %vm40_vm3, %vm41_vm2 }
  0xff   :  { %v36_v19 = vmul.f32 %v66_v17, %v35_v18 }
 0x101   :  { %v37_v20 = vmul.f32 0.5, %v36_v19 }
 0x103   :  { %v38_v21 = vsub.f32 1.5, %v37_v20 }
 0x105   :  { %v39_v22 = vmul.f32 %v66_v17, %v38_v21 }
 0x107   :  { %v43_v24 = vsel %vm42_vm4, %v66_v17, %v39_v22 }
 0x108   :  { %v44_v26 = vmul.f32 %v43_v24, %v27_v11 }
 0x10a   :  { %v49_v27 = vmul.f32 %v61_v23, %v44_v26 }
 0x10c   :  { %v54_v28 = vadd.f32 %v62_v25, %v49_v27 }
 0x10e   :  { %55 = vst.msk [vmem:[%s106_s3] sm:$0xff] %vm15_vm0, %v54_v28 }

// kernel: _lambda_.49
= control target key start
LH: loop header
LB: loop body
LE: loop exit
PB: predicated region body
PF: predicated region fallthrough
CT: control target
= control target key end

     0   :  { %vm22_vm0 = vcmask 261120   ;;  %v123_v2 = vmov 32.0   ;;  %s178_s0 = inlined_call_operand.vmem [shape: f32[8,32], index: 0, kind: input, shape index: {}]   ;;  %s179_s1 = inlined_call_operand.vmem [shape: f32[1,32], index: 1, kind: input, shape index: {}]   ;;  %s180_s2 = inlined_call_operand.vmem [shape: f32[1,32], index: 2, kind: input, shape index: {}]   ;;  %s181_s4 = inlined_call_operand.vmem [shape: f32[1,128], index: 4, kind: input, shape index: {}]   ;;  %s182_s3 = inlined_call_operand.vmem [shape: bf16[32,128], index: 3, kind: input, shape index: {}]   ;;  %s183_s5 = inlined_call_operand.vmem [shape: f32[8,128], index: 5, kind: output, shape index: {}]  }
   0x1   :  { %v21_v0 = vld [vmem:[%s178_s0] sm:$0xff]  ;;  %119 = vrcp.f32 %v123_v2  ;;  %v114_v14 = vld [vmem:[%s182_s3 + $0x8] sm:$0xff] }
   0x2   :  { %v23_v1 = vsel %vm22_vm0, %v21_v0, 0.0  ;;  %92 = vmatpush.bf16.msra.mxu0 %v114_v14  ;;  %v113_v15 = vld [vmem:[%s182_s3] sm:$0xff] }
   0x3   :  { %24 = vadd.xlane.f32.xlu0 %v23_v1  ;;  %v116_v25 = vld [vmem:[%s179_s1] ss:$0 sm:$0xff] }
   0x4   :  { %v117_v28 = vld [vmem:[%s180_s2] ss:$0 sm:$0xff] }
   0x5   :  { %v118_v32 = vld [vmem:[%s181_s4] ss:$0 sm:$0xff] }
   0x6   :  { %93 = vmatpush.bf16.msra.mxu0 %v113_v15 }
   0x7   :  { %v120_v3 = vpop.eup %119 }
   0x8   :  { %v27_v4 = vmul.f32 32.0, %v120_v3  ;;  %vm31_vm1 = vweird.f32 %v120_v3 }
   0xa   :  { %v28_v5 = vsub.f32 1.0, %v27_v4 }
   0xc   :  { %v29_v6 = vmul.f32 %v120_v3, %v28_v5 }
   0xe   :  { %v30_v7 = vadd.f32 %v120_v3, %v29_v6 }
  0x10   :  { %v32_v8 = vsel %vm31_vm1, %v120_v3, %v30_v7 }
  0x76   :  { %v25_v9 = vpop.xlane.xlu0 %24 }
  0x77   :  { %v33_v10 = vmul.f32 %v32_v8, %v25_v9 }
  0x79   :  { %v34_v11 = vsub.f32 %v21_v0, %v33_v10 }
  0x7b   :  { %v35_v12 = vmul.f32 %v34_v11, %v34_v11 }
  0x7d   :  { %v36_v13 = vsel %vm22_vm0, %v35_v12, 0.0 }
  0x7e   :  { %37 = vadd.xlane.f32.xlu0 %v36_v13 }
  0xf1   :  { %v38_v16 = vpop.xlane.xlu0 %37 }
  0xf2   :  { %v39_v17 = vmul.f32 %v38_v16, %v32_v8 }
  0xf4   :  { %v40_v18 = vadd.f32 1e-05, %v39_v17 }
  0xf6   :  { %121 = vrsqrt.f32 %v40_v18  ;;  %vm47_vm3 = vweird.f32 %v40_v18 }
  0xfc   :  { %v122_v19 = vpop.eup %121 }
  0xfd   :  { %v42_v20 = vmul.f32 %v122_v19, %v40_v18  ;;  %vm48_vm2 = vweird.f32 %v122_v19 }
  0xfe   :  { %vm49_vm4 = vmor %vm47_vm3, %vm48_vm2 }
  0xff   :  { %v43_v21 = vmul.f32 %v122_v19, %v42_v20 }
 0x101   :  { %v44_v22 = vmul.f32 0.5, %v43_v21 }
 0x103   :  { %v45_v23 = vsub.f32 1.5, %v44_v22 }
 0x105   :  { %v46_v24 = vmul.f32 %v122_v19, %v45_v23 }
 0x107   :  { %v50_v26 = vsel %vm49_vm4, %v122_v19, %v46_v24 }
 0x108   :  { %v51_v27 = vmul.f32 %v50_v26, %v34_v11 }
 0x10a   :  { %v56_v29 = vmul.f32 %v116_v25, %v51_v27 }
 0x10c   :  { %v61_v30 = vadd.f32 %v117_v28, %v56_v29 }
 0x10e   :  { %v62_v31 = vpack.c.bf16 %v61_v30, %v61_v30 }
 0x110   :  { %112 = vmatmul.msk.bf16.vlgmr.msra.gmra.mxu0 %vm22_vm0, %v62_v31 }
 0x18d   :  { %v95_v33 = vpop.f32.mrf.mxu0 }
 0x18e   :  { %v96_v34 = vadd.f32 %v118_v32, %v95_v33 }
 0x190   :  { %99 = vst [vmem:[%s183_s5] sm:$0xff] %v96_v34 }
 0x195   :  { %v97_v35 = vpop.f32.mrf.mxu0 }

</bundles_post_ra>
